<compile_context>
chip_gen: v5e
topology: v5e:2x2
jax: 0.10.0
libtpu: 0.0.40
codegen_flags: <defaults>
</compile_context>

<pallas_src>
import math
import functools

import jax
import jax.numpy as jnp
from jax.experimental import pallas as pl
from jax.experimental.pallas import tpu as pltpu


def _round_up(x: int, m: int) -> int:
    return ((x + m - 1) // m) * m


def _cdiv(a: int, b: int) -> int:
    return (a + b - 1) // b


_HAS_BUFFERED = hasattr(pl, "Buffered")


def _vmem_capacity_bytes() -> int:
    """Per-core VMEM capacity; conservative (v7x) fallback if the query fails."""
    try:
        info = pltpu.get_tpu_info()
        cap = getattr(info, "vmem_capacity_bytes", None)
        if cap:
            return int(cap)
    except Exception:
        pass
    return 64 << 20


# ---------------------------------------------------------------------------
# Kernel
# ---------------------------------------------------------------------------
def _scalar_encoder_kernel(pos_ref, freq_ref, phase_ref,
                           w1_ref, b1_ref, w2_ref, b2_ref,
                           gamma_ref, beta_ref, mask_ref, out_ref, *, hidden_dim):
    """One batch tile of the ScalarEncoder forward.

    pos_ref   : (TB, 1)     f32   (streamed per grid step)
    freq_ref  : (1, Hp)     f32   (2*pi folded in; padded lanes = 0)
    phase_ref : (1, Hp)     f32   (2*pi folded in; padded lanes = 0)
    w1_ref    : (Hp, H4p)   bf16  (padded rows/cols = 0)
    b1_ref    : (1, H4p)    f32
    w2_ref    : (H4p, Hp)   bf16  (padded rows/cols = 0)
    b2_ref    : (1, Hp)     f32   (padded lanes = 0)
    gamma_ref : (1, Hp)     f32   (padded lanes = 0)
    beta_ref  : (1, Hp)     f32   (padded lanes = 0)
    mask_ref  : (1, Hp)     f32   (1.0 on true lanes, 0.0 on padding)
    out_ref   : (TB, Hp)    f32
    """
    pos = pos_ref[...]                                          # (TB, 1)

    # FourierEncoding: cos(2*pi*(f*x + p)); 2*pi folded into freq/phase offline.
    fe = jnp.cos(freq_ref[...] * pos + phase_ref[...])          # (TB, Hp) f32
    # Padded lanes give cos(0)=1, but the matching w1 rows are zero, so they
    # contribute nothing to the first matmul.

    # MLP: Linear -> ReLU -> Linear.  bf16 MXU matmuls, f32 accumulation.
    h = jnp.dot(fe.astype(w1_ref.dtype), w1_ref[...],
                preferred_element_type=jnp.float32) + b1_ref[...]
    h = jnp.maximum(h, 0.0)                                     # (TB, H4p)
    y = jnp.dot(h.astype(w2_ref.dtype), w2_ref[...],
                preferred_element_type=jnp.float32) + b2_ref[...]   # (TB, Hp)

    # LayerNorm over the true hidden_dim.  Invariant from prepare_params: lanes
    # >= hidden_dim of y are exactly 0 (zero w2 columns and zero b2 lanes), so
    # the unmasked sum already equals the sum over the valid lanes.
    inv_h = 1.0 / hidden_dim
    mean = jnp.sum(y, axis=-1, keepdims=True) * inv_h
    centered = y - mean
    if y.shape[-1] != hidden_dim:
        centered = centered * mask_ref[...]          # zero the padded lanes
    var = jnp.sum(centered * centered, axis=-1, keepdims=True) * inv_h
    norm = centered * jax.lax.rsqrt(var + 1e-5)
    # Padded lanes: norm = 0 and gamma/beta = 0 there -> output 0 (sliced off outside).
    out_ref[...] = norm * gamma_ref[...] + beta_ref[...]


# ---------------------------------------------------------------------------
# Wrapper
# ---------------------------------------------------------------------------
def prepare_params(params, weights_dtype=jnp.bfloat16):
    """One-time parameter prep: pad feature dims to multiples of 128 lanes (all
    padding is EXACTLY zero -- the in-kernel LayerNorm relies on this), fold 2*pi
    into the Fourier frequencies/phases, cast MLP weights to `weights_dtype`."""
    H = params["frequencies"].shape[0]
    H4 = params["w1"].shape[1]
    Hp = _round_up(H, 128)
    H4p = _round_up(H4, 128)
    two_pi = 2.0 * math.pi

    def pad_row(v, n):
        v = jnp.asarray(v, jnp.float32)
        return jnp.pad(v, (0, n - v.shape[0])).reshape(1, n)

    return dict(
        freq2p=pad_row(params["frequencies"] * two_pi, Hp),
        phase2p=pad_row(params["phases"] * two_pi, Hp),
        w1=jnp.pad(jnp.asarray(params["w1"], jnp.float32),
                   ((0, Hp - H), (0, H4p - H4))).astype(weights_dtype),
        b1=pad_row(params["b1"], H4p),
        w2=jnp.pad(jnp.asarray(params["w2"], jnp.float32),
                   ((0, H4p - H4), (0, Hp - H))).astype(weights_dtype),
        b2=pad_row(params["b2"], Hp),
        gamma=pad_row(params["gamma"], Hp),
        beta=pad_row(params["beta"], Hp),
        mask=pad_row(jnp.ones((H,), jnp.float32), Hp),
    )


@functools.partial(jax.jit,
                   static_argnames=("hidden_dim", "block_b", "single_buffer_residents"))
def scalar_encoder(pos, prepared, *, hidden_dim, block_b=512,
                   single_buffer_residents=True):
    """pos: (B,) -> (B, hidden_dim) float32."""
    B = pos.shape[0]
    Hp = prepared["gamma"].shape[1]
    H4p = prepared["b1"].shape[1]

    # Batch tile: multiple of 16 sublane-rows (full packed bf16 vregs), capped at
    # block_b.  When there are enough rows, ensure >= 2 grid steps so v7x's
    # second TensorCore has work (no-op on single-TC v5e/v6e).
    TB = min(block_b, _round_up(max(B, 16), 16))
    if B > 16:
        TB = min(TB, _round_up(_cdiv(B, 2), 16))
    Bp = _round_up(B, TB)
    grid = (Bp // TB,)

    pos2d = jnp.pad(pos.astype(jnp.float32), (0, Bp - B)).reshape(Bp, 1)

    use_single_buf = single_buffer_residents and _HAS_BUFFERED

    def resident(shape):   # VMEM-resident across all grid steps
        if use_single_buf:
            # Constant index_map -> no re-DMA; Buffered(1) -> no wasted 2nd buffer.
            return pl.BlockSpec(shape, lambda i: (0, 0),
                                pipeline_mode=pl.Buffered(1))
        return pl.BlockSpec(shape, lambda i: (0, 0))

    in_specs = [
        pl.BlockSpec((TB, 1), lambda i: (i, 0)),   # pos (streamed)
        resident((1, Hp)),                          # frequencies * 2pi
        resident((1, Hp)),                          # phases * 2pi
        resident((Hp, H4p)),                        # w1 (bf16)
        resident((1, H4p)),                         # b1
        resident((H4p, Hp)),                        # w2 (bf16)
        resident((1, Hp)),                          # b2
        resident((1, Hp)),                          # LN gamma
        resident((1, Hp)),                          # LN beta
        resident((1, Hp)),                          # valid-lane mask
    ]
    out_spec = pl.BlockSpec((TB, Hp), lambda i: (i, 0))

    # --- VMEM budget (honest per-buffer accounting) ------------------------
    wbytes = prepared["w1"].dtype.itemsize
    n_res_buf = 1 if use_single_buf else 2
    param_bytes = n_res_buf * (2 * Hp * H4p * wbytes + (6 * Hp + H4p) * 4)
    io_bytes = 2 * (TB * 128 * 4 + TB * Hp * 4)      # double-buffered pos/out tiles
    act_bytes = TB * (2 * Hp * 4 + 2 * H4p * 4 + (Hp + H4p) * wbytes)
    need = param_bytes + io_bytes + act_bytes

    # Generation-aware ceiling: ~85% of physical per-core VMEM leaves headroom
    # for Mosaic internal scratch / semaphores (matters on v7x's 64 MiB; allows
    # >64 MiB on v5e/v6e's 128 MiB for large hidden_dim).
    vmem_ceiling = int(_vmem_capacity_bytes() * 0.85)
    vmem_limit = min(max(2 * need + (4 << 20), 16 << 20), vmem_ceiling)

    cost = pl.CostEstimate(
        flops=4 * Bp * Hp * H4p,                     # two matmuls (2*M*N*K each)
        transcendentals=Bp * Hp,                     # cos
        bytes_accessed=int(Bp * 4 + param_bytes + Bp * Hp * 4),
    )

    out = pl.pallas_call(
        functools.partial(_scalar_encoder_kernel, hidden_dim=hidden_dim),
        out_shape=jax.ShapeDtypeStruct((Bp, Hp), jnp.float32),
        grid=grid,
        in_specs=in_specs,
        out_specs=out_spec,
        compiler_params=pltpu.CompilerParams(
            dimension_semantics=("parallel",),
            vmem_limit_bytes=int(vmem_limit)),
        cost_estimate=cost,
    )(pos2d, prepared["freq2p"], prepared["phase2p"],
      prepared["w1"], prepared["b1"], prepared["w2"], prepared["b2"],
      prepared["gamma"], prepared["beta"], prepared["mask"])

    # TODO(synk): if the consumer tolerates the padded (B, Hp) layout or bf16,
    # drop this slice / emit bf16 to cut HBM writeback.
    return out[:B, :hidden_dim]


# ---------------------------------------------------------------------------
# Parameter init (mirrors the PyTorch module) and references
# ---------------------------------------------------------------------------
def _xavier_uniform(key, shape, gain):
    fan_in, fan_out = shape            # weight stored as (in, out) for x @ W
    bound = gain * math.sqrt(6.0 / (fan_in + fan_out))
    return jax.random.uniform(key, shape, jnp.float32, -bound, bound)


def make_params(key, hidden_dim, mlp_ratio=4.0):
    h4 = int(hidden_dim * mlp_ratio)
    k_freq, k_phase, k_w1, k_w2 = jax.random.split(key, 4)
    return dict(
        frequencies=jax.random.normal(k_freq, (hidden_dim,), jnp.float32),
        phases=jax.random.uniform(k_phase, (hidden_dim,), jnp.float32),
        w1=_xavier_uniform(k_w1, (hidden_dim, h4), math.sqrt(2.0)),
        b1=jnp.zeros((h4,), jnp.float32),
        w2=_xavier_uniform(k_w2, (h4, hidden_dim), math.sqrt(2.0)),
        b2=jnp.zeros((hidden_dim,), jnp.float32),
        gamma=jnp.ones((hidden_dim,), jnp.float32),
        beta=jnp.zeros((hidden_dim,), jnp.float32),
    )


def reference_fp32(pos, p):
    """Pure-JAX mirror of the PyTorch module in full float32."""
    x = pos.astype(jnp.float32)[:, None]
    fe = jnp.cos(2.0 * jnp.pi * (p["frequencies"][None, :] * x + p["phases"][None, :]))
    h = jnp.maximum(jnp.dot(fe, p["w1"], precision=jax.lax.Precision.HIGHEST) + p["b1"], 0.0)
    y = jnp.dot(h, p["w2"], precision=jax.lax.Precision.HIGHEST) + p["b2"]
    mean = jnp.mean(y, axis=-1, keepdims=True)
    var = jnp.mean((y - mean) ** 2, axis=-1, keepdims=True)
    return (y - mean) / jnp.sqrt(var + 1e-5) * p["gamma"] + p["beta"]


def reference_prepared(pos, prepared, hidden_dim):
    """Mirrors the kernel's numerics (bf16 weights/activations into the matmuls,
    f32 accumulation) using the same prepared/padded parameters."""
    x = pos.astype(jnp.float32)[:, None]
    fe = jnp.cos(prepared["freq2p"] * x + prepared["phase2p"])
    h = jnp.dot(fe.astype(prepared["w1"].dtype), prepared["w1"],
                preferred_element_type=jnp.float32) + prepared["b1"]
    h = jnp.maximum(h, 0.0)
    y = jnp.dot(h.astype(prepared["w2"].dtype), prepared["w2"],
                preferred_element_type=jnp.float32) + prepared["b2"]
    y = y[:, :hidden_dim]
    mean = jnp.mean(y, axis=-1, keepdims=True)
    var = jnp.mean((y - mean) ** 2, axis=-1, keepdims=True)
    yn = (y - mean) * jax.lax.rsqrt(var + 1e-5)
    return yn * prepared["gamma"][:, :hidden_dim] + prepared["beta"][:, :hidden_dim]


if __name__ == "__main__":
    hidden_dim = 32
    batch = 8

    key = jax.random.PRNGKey(0)
    k_params, k_pos = jax.random.split(key)
    params = make_params(k_params, hidden_dim, mlp_ratio=4.0)
    prepared = prepare_params(params)        # one-time: pad, fold 2*pi, bf16 weights

    # cfg_scale: one scalar per batch element
    cfg_scale = jax.random.uniform(k_pos, (batch,), jnp.float32, 0.0, 10.0)

    try:
        out = scalar_encoder(cfg_scale, prepared, hidden_dim=hidden_dim)
        out = jax.block_until_ready(out)
    except Exception:
        # Fallback for jax versions without BlockSpec(pipeline_mode=pl.Buffered(1)).
        out = scalar_encoder(cfg_scale, prepared, hidden_dim=hidden_dim,
                             single_buffer_residents=False)
        out = jax.block_until_ready(out)
    assert out.shape == (batch, hidden_dim)

    # Check against a reference that models the kernel's bf16-weight numerics
    # (tolerance dominated by cos ULP differences interacting with bf16 rounding).
    ref_bf16 = reference_prepared(cfg_scale, prepared, hidden_dim)
    assert jnp.allclose(out, ref_bf16, atol=1e-2, rtol=1e-2), \
        "mismatch vs bf16-mirroring reference"

    # Fidelity check against the full-precision module; tolerance set by bf16 weights.
    ref_f32 = reference_fp32(cfg_scale, params)
    assert jnp.allclose(out, ref_f32, atol=3e-2, rtol=3e-2), \
        "mismatch vs float32 reference"

    print("KERNEL_OK")
</pallas_src>

<mosaic_0001>
module attributes {stable_mosaic.version = 11 : i64} {
  func.func @_scalar_encoder_kernel(%arg0: i32, %arg1: memref<16x1xf32, #tpu.memory_space<vmem>>, %arg2: memref<1x128xf32, #tpu.memory_space<vmem>>, %arg3: memref<1x128xf32, #tpu.memory_space<vmem>>, %arg4: memref<128x128xbf16, #tpu.memory_space<vmem>>, %arg5: memref<1x128xf32, #tpu.memory_space<vmem>>, %arg6: memref<128x128xbf16, #tpu.memory_space<vmem>>, %arg7: memref<1x128xf32, #tpu.memory_space<vmem>>, %arg8: memref<1x128xf32, #tpu.memory_space<vmem>>, %arg9: memref<1x128xf32, #tpu.memory_space<vmem>>, %arg10: memref<1x128xf32, #tpu.memory_space<vmem>>, %arg11: memref<16x128xf32, #tpu.memory_space<vmem>>) attributes {dimension_semantics = [#tpu.dimension_semantics<parallel>], iteration_bounds = array<i64: 1>, scalar_prefetch = 0 : i64, scratch_operands = 0 : i64, tpu.core_type = #tpu.core_type<tc>, window_params = [{transform_indices = @transform_0, window_bounds = array<i64: 16, 1>}, {pipeline_mode = #tpu.pipeline_mode<synchronous>, transform_indices = @transform_1, window_bounds = array<i64: 1, 128>}, {pipeline_mode = #tpu.pipeline_mode<synchronous>, transform_indices = @transform_2, window_bounds = array<i64: 1, 128>}, {pipeline_mode = #tpu.pipeline_mode<synchronous>, transform_indices = @transform_3, window_bounds = array<i64: 128, 128>}, {pipeline_mode = #tpu.pipeline_mode<synchronous>, transform_indices = @transform_4, window_bounds = array<i64: 1, 128>}, {pipeline_mode = #tpu.pipeline_mode<synchronous>, transform_indices = @transform_5, window_bounds = array<i64: 128, 128>}, {pipeline_mode = #tpu.pipeline_mode<synchronous>, transform_indices = @transform_6, window_bounds = array<i64: 1, 128>}, {pipeline_mode = #tpu.pipeline_mode<synchronous>, transform_indices = @transform_7, window_bounds = array<i64: 1, 128>}, {pipeline_mode = #tpu.pipeline_mode<synchronous>, transform_indices = @transform_8, window_bounds = array<i64: 1, 128>}, {pipeline_mode = #tpu.pipeline_mode<synchronous>, transform_indices = @transform_9, window_bounds = array<i64: 1, 128>}, {transform_indices = @transform_10, window_bounds = array<i64: 16, 128>}]} {
    %c0 = arith.constant 0 : index
    %c0_0 = arith.constant 0 : index
    %0 = vector.load %arg1[%c0, %c0_0] : memref<16x1xf32, #tpu.memory_space<vmem>>, vector<16x1xf32>
    %c0_1 = arith.constant 0 : index
    %c0_2 = arith.constant 0 : index
    %1 = vector.load %arg2[%c0_1, %c0_2] : memref<1x128xf32, #tpu.memory_space<vmem>>, vector<1x128xf32>
    %2 = vector.broadcast %1 : vector<1x128xf32> to vector<16x128xf32>
    %3 = vector.broadcast %0 : vector<16x1xf32> to vector<16x128xf32>
    %4 = arith.mulf %2, %3 : vector<16x128xf32>
    %c0_3 = arith.constant 0 : index
    %c0_4 = arith.constant 0 : index
    %5 = vector.load %arg3[%c0_3, %c0_4] : memref<1x128xf32, #tpu.memory_space<vmem>>, vector<1x128xf32>
    %6 = vector.broadcast %5 : vector<1x128xf32> to vector<16x128xf32>
    %7 = arith.addf %4, %6 : vector<16x128xf32>
    %8 = math.cos %7 : vector<16x128xf32>
    %9 = arith.truncf %8 : vector<16x128xf32> to vector<16x128xbf16>
    %c0_5 = arith.constant 0 : index
    %c0_6 = arith.constant 0 : index
    %10 = vector.load %arg4[%c0_5, %c0_6] : memref<128x128xbf16, #tpu.memory_space<vmem>>, vector<128x128xbf16>
    %cst = arith.constant dense<0.000000e+00> : vector<16x128xf32>
    %11 = tpu.matmul %9, %10, %cst {dimension_numbers = #tpu.dot_dimension_numbers<[1], [0], [0], [1], [0, 0, 1, 1], [], []>} : vector<16x128xbf16>, vector<128x128xbf16>, vector<16x128xf32> -> vector<16x128xf32>
    %c0_7 = arith.constant 0 : index
    %c0_8 = arith.constant 0 : index
    %12 = vector.load %arg5[%c0_7, %c0_8] : memref<1x128xf32, #tpu.memory_space<vmem>>, vector<1x128xf32>
    %13 = vector.broadcast %12 : vector<1x128xf32> to vector<16x128xf32>
    %14 = arith.addf %11, %13 : vector<16x128xf32>
    %cst_9 = arith.constant 0.000000e+00 : f32
    %15 = vector.broadcast %cst_9 : f32 to vector<16x128xf32>
    %16 = arith.maximumf %14, %15 : vector<16x128xf32>
    %17 = arith.truncf %16 : vector<16x128xf32> to vector<16x128xbf16>
    %c0_10 = arith.constant 0 : index
    %c0_11 = arith.constant 0 : index
    %18 = vector.load %arg6[%c0_10, %c0_11] : memref<128x128xbf16, #tpu.memory_space<vmem>>, vector<128x128xbf16>
    %cst_12 = arith.constant dense<0.000000e+00> : vector<16x128xf32>
    %19 = tpu.matmul %17, %18, %cst_12 {dimension_numbers = #tpu.dot_dimension_numbers<[1], [0], [0], [1], [0, 0, 1, 1], [], []>} : vector<16x128xbf16>, vector<128x128xbf16>, vector<16x128xf32> -> vector<16x128xf32>
    %c0_13 = arith.constant 0 : index
    %c0_14 = arith.constant 0 : index
    %20 = vector.load %arg7[%c0_13, %c0_14] : memref<1x128xf32, #tpu.memory_space<vmem>>, vector<1x128xf32>
    %21 = vector.broadcast %20 : vector<1x128xf32> to vector<16x128xf32>
    %22 = arith.addf %19, %21 : vector<16x128xf32>
    %cst_15 = arith.constant dense<0.000000e+00> : vector<16xf32>
    %23 = vector.multi_reduction <add>, %22, %cst_15 [1] : vector<16x128xf32> to vector<16xf32>
    %24 = vector.shape_cast %23 : vector<16xf32> to vector<16x1xf32>
    %cst_16 = arith.constant 3.125000e-02 : f32
    %25 = vector.broadcast %cst_16 : f32 to vector<16x1xf32>
    %26 = arith.mulf %24, %25 : vector<16x1xf32>
    %27 = vector.broadcast %26 : vector<16x1xf32> to vector<16x128xf32>
    %28 = arith.subf %22, %27 : vector<16x128xf32>
    %c0_17 = arith.constant 0 : index
    %c0_18 = arith.constant 0 : index
    %29 = vector.load %arg10[%c0_17, %c0_18] : memref<1x128xf32, #tpu.memory_space<vmem>>, vector<1x128xf32>
    %30 = vector.broadcast %29 : vector<1x128xf32> to vector<16x128xf32>
    %31 = arith.mulf %28, %30 : vector<16x128xf32>
    %32 = arith.mulf %31, %31 : vector<16x128xf32>
    %cst_19 = arith.constant dense<0.000000e+00> : vector<16xf32>
    %33 = vector.multi_reduction <add>, %32, %cst_19 [1] : vector<16x128xf32> to vector<16xf32>
    %34 = vector.shape_cast %33 : vector<16xf32> to vector<16x1xf32>
    %cst_20 = arith.constant 3.125000e-02 : f32
    %35 = vector.broadcast %cst_20 : f32 to vector<16x1xf32>
    %36 = arith.mulf %34, %35 : vector<16x1xf32>
    %cst_21 = arith.constant 9.99999974E-6 : f32
    %37 = vector.broadcast %cst_21 : f32 to vector<16x1xf32>
    %38 = arith.addf %36, %37 : vector<16x1xf32>
    %39 = math.rsqrt %38 : vector<16x1xf32>
    %40 = vector.broadcast %39 : vector<16x1xf32> to vector<16x128xf32>
    %41 = arith.mulf %31, %40 : vector<16x128xf32>
    %c0_22 = arith.constant 0 : index
    %c0_23 = arith.constant 0 : index
    %42 = vector.load %arg8[%c0_22, %c0_23] : memref<1x128xf32, #tpu.memory_space<vmem>>, vector<1x128xf32>
    %43 = vector.broadcast %42 : vector<1x128xf32> to vector<16x128xf32>
    %44 = arith.mulf %41, %43 : vector<16x128xf32>
    %c0_24 = arith.constant 0 : index
    %c0_25 = arith.constant 0 : index
    %45 = vector.load %arg9[%c0_24, %c0_25] : memref<1x128xf32, #tpu.memory_space<vmem>>, vector<1x128xf32>
    %46 = vector.broadcast %45 : vector<1x128xf32> to vector<16x128xf32>
    %47 = arith.addf %44, %46 : vector<16x128xf32>
    %c0_26 = arith.constant 0 : index
    %c0_27 = arith.constant 0 : index
    %48 = vector.load %arg11[%c0_26, %c0_27] : memref<16x128xf32, #tpu.memory_space<vmem>>, vector<16x128xf32>
    tpu.vector_store %arg11[%c0_26, %c0_27], %47 {strides = array<i32>} : memref<16x128xf32, #tpu.memory_space<vmem>>, vector<16x128xf32>,
    return
  }
  func.func @transform_0(%arg0: i32) -> (i32, i32) {
    %c0_i32 = arith.constant 0 : i32
    %c0_i32_0 = arith.constant 0 : i32
    return %arg0, %c0_i32 : i32, i32
  }
  func.func @transform_1(%arg0: i32) -> (i32, i32) {
    %c0_i32 = arith.constant 0 : i32
    %c0_i32_0 = arith.constant 0 : i32
    %c0_i32_1 = arith.constant 0 : i32
    return %c0_i32, %c0_i32_0 : i32, i32
  }
  func.func @transform_2(%arg0: i32) -> (i32, i32) {
    %c0_i32 = arith.constant 0 : i32
    %c0_i32_0 = arith.constant 0 : i32
    %c0_i32_1 = arith.constant 0 : i32
    return %c0_i32, %c0_i32_0 : i32, i32
  }
  func.func @transform_3(%arg0: i32) -> (i32, i32) {
    %c0_i32 = arith.constant 0 : i32
    %c0_i32_0 = arith.constant 0 : i32
    %c0_i32_1 = arith.constant 0 : i32
    return %c0_i32, %c0_i32_0 : i32, i32
  }
  func.func @transform_4(%arg0: i32) -> (i32, i32) {
    %c0_i32 = arith.constant 0 : i32
    %c0_i32_0 = arith.constant 0 : i32
    %c0_i32_1 = arith.constant 0 : i32
    return %c0_i32, %c0_i32_0 : i32, i32
  }
  func.func @transform_5(%arg0: i32) -> (i32, i32) {
    %c0_i32 = arith.constant 0 : i32
    %c0_i32_0 = arith.constant 0 : i32
    %c0_i32_1 = arith.constant 0 : i32
    return %c0_i32, %c0_i32_0 : i32, i32
  }
  func.func @transform_6(%arg0: i32) -> (i32, i32) {
    %c0_i32 = arith.constant 0 : i32
    %c0_i32_0 = arith.constant 0 : i32
    %c0_i32_1 = arith.constant 0 : i32
    return %c0_i32, %c0_i32_0 : i32, i32
  }
  func.func @transform_7(%arg0: i32) -> (i32, i32) {
    %c0_i32 = arith.constant 0 : i32
    %c0_i32_0 = arith.constant 0 : i32
    %c0_i32_1 = arith.constant 0 : i32
    return %c0_i32, %c0_i32_0 : i32, i32
  }
  func.func @transform_8(%arg0: i32) -> (i32, i32) {
    %c0_i32 = arith.constant 0 : i32
    %c0_i32_0 = arith.constant 0 : i32
    %c0_i32_1 = arith.constant 0 : i32
    return %c0_i32, %c0_i32_0 : i32, i32
  }
  func.func @transform_9(%arg0: i32) -> (i32, i32) {
    %c0_i32 = arith.constant 0 : i32
    %c0_i32_0 = arith.constant 0 : i32
    %c0_i32_1 = arith.constant 0 : i32
    return %c0_i32, %c0_i32_0 : i32, i32
  }
  func.func @transform_10(%arg0: i32) -> (i32, i32) {
    %c0_i32 = arith.constant 0 : i32
    %c0_i32_0 = arith.constant 0 : i32
    return %arg0, %c0_i32 : i32, i32
  }
}

module attributes {stable_mosaic.version = 11 : i64} {
  func.func @_scalar_encoder_kernel(%arg0: i32, %arg1: memref<16x1xf32, #tpu.memory_space<vmem>>, %arg2: memref<1x128xf32, #tpu.memory_space<vmem>>, %arg3: memref<1x128xf32, #tpu.memory_space<vmem>>, %arg4: memref<128x128xbf16, #tpu.memory_space<vmem>>, %arg5: memref<1x128xf32, #tpu.memory_space<vmem>>, %arg6: memref<128x128xbf16, #tpu.memory_space<vmem>>, %arg7: memref<1x128xf32, #tpu.memory_space<vmem>>, %arg8: memref<1x128xf32, #tpu.memory_space<vmem>>, %arg9: memref<1x128xf32, #tpu.memory_space<vmem>>, %arg10: memref<1x128xf32, #tpu.memory_space<vmem>>, %arg11: memref<16x128xf32, #tpu.memory_space<vmem>>) attributes {dimension_semantics = [#tpu.dimension_semantics<parallel>], iteration_bounds = array<i64: 1>, scalar_prefetch = 0 : i64, scratch_operands = 0 : i64, tpu.core_type = #tpu.core_type<tc>, window_params = [{transform_indices = @transform_0, window_bounds = array<i64: 16, 1>}, {pipeline_mode = #tpu.pipeline_mode<synchronous>, transform_indices = @transform_1, window_bounds = array<i64: 1, 128>}, {pipeline_mode = #tpu.pipeline_mode<synchronous>, transform_indices = @transform_2, window_bounds = array<i64: 1, 128>}, {pipeline_mode = #tpu.pipeline_mode<synchronous>, transform_indices = @transform_3, window_bounds = array<i64: 128, 128>}, {pipeline_mode = #tpu.pipeline_mode<synchronous>, transform_indices = @transform_4, window_bounds = array<i64: 1, 128>}, {pipeline_mode = #tpu.pipeline_mode<synchronous>, transform_indices = @transform_5, window_bounds = array<i64: 128, 128>}, {pipeline_mode = #tpu.pipeline_mode<synchronous>, transform_indices = @transform_6, window_bounds = array<i64: 1, 128>}, {pipeline_mode = #tpu.pipeline_mode<synchronous>, transform_indices = @transform_7, window_bounds = array<i64: 1, 128>}, {pipeline_mode = #tpu.pipeline_mode<synchronous>, transform_indices = @transform_8, window_bounds = array<i64: 1, 128>}, {pipeline_mode = #tpu.pipeline_mode<synchronous>, transform_indices = @transform_9, window_bounds = array<i64: 1, 128>}, {transform_indices = @transform_10, window_bounds = array<i64: 16, 128>}]} {
    %c0 = arith.constant 0 : index
    %c0_0 = arith.constant 0 : index
    %0 = vector.load %arg1[%c0, %c0_0] : memref<16x1xf32, #tpu.memory_space<vmem>>, vector<16x1xf32>
    %c0_1 = arith.constant 0 : index
    %c0_2 = arith.constant 0 : index
    %1 = vector.load %arg2[%c0_1, %c0_2] : memref<1x128xf32, #tpu.memory_space<vmem>>, vector<1x128xf32>
    %2 = vector.broadcast %1 : vector<1x128xf32> to vector<16x128xf32>
    %3 = vector.broadcast %0 : vector<16x1xf32> to vector<16x128xf32>
    %4 = arith.mulf %2, %3 : vector<16x128xf32>
    %c0_3 = arith.constant 0 : index
    %c0_4 = arith.constant 0 : index
    %5 = vector.load %arg3[%c0_3, %c0_4] : memref<1x128xf32, #tpu.memory_space<vmem>>, vector<1x128xf32>
    %6 = vector.broadcast %5 : vector<1x128xf32> to vector<16x128xf32>
    %7 = arith.addf %4, %6 : vector<16x128xf32>
    %8 = math.cos %7 : vector<16x128xf32>
    %9 = arith.truncf %8 : vector<16x128xf32> to vector<16x128xbf16>
    %c0_5 = arith.constant 0 : index
    %c0_6 = arith.constant 0 : index
    %10 = vector.load %arg4[%c0_5, %c0_6] : memref<128x128xbf16, #tpu.memory_space<vmem>>, vector<128x128xbf16>
    %cst = arith.constant dense<0.000000e+00> : vector<16x128xf32>
    %11 = tpu.matmul %9, %10, %cst {dimension_numbers = #tpu.dot_dimension_numbers<[1], [0], [0], [1], [0, 0, 1, 1], [], []>} : vector<16x128xbf16>, vector<128x128xbf16>, vector<16x128xf32> -> vector<16x128xf32>
    %c0_7 = arith.constant 0 : index
    %c0_8 = arith.constant 0 : index
    %12 = vector.load %arg5[%c0_7, %c0_8] : memref<1x128xf32, #tpu.memory_space<vmem>>, vector<1x128xf32>
    %13 = vector.broadcast %12 : vector<1x128xf32> to vector<16x128xf32>
    %14 = arith.addf %11, %13 : vector<16x128xf32>
    %cst_9 = arith.constant 0.000000e+00 : f32
    %15 = vector.broadcast %cst_9 : f32 to vector<16x128xf32>
    %16 = arith.maximumf %14, %15 : vector<16x128xf32>
    %17 = arith.truncf %16 : vector<16x128xf32> to vector<16x128xbf16>
    %c0_10 = arith.constant 0 : index
    %c0_11 = arith.constant 0 : index
    %18 = vector.load %arg6[%c0_10, %c0_11] : memref<128x128xbf16, #tpu.memory_space<vmem>>, vector<128x128xbf16>
    %cst_12 = arith.constant dense<0.000000e+00> : vector<16x128xf32>
    %19 = tpu.matmul %17, %18, %cst_12 {dimension_numbers = #tpu.dot_dimension_numbers<[1], [0], [0], [1], [0, 0, 1, 1], [], []>} : vector<16x128xbf16>, vector<128x128xbf16>, vector<16x128xf32> -> vector<16x128xf32>
    %c0_13 = arith.constant 0 : index
    %c0_14 = arith.constant 0 : index
    %20 = vector.load %arg7[%c0_13, %c0_14] : memref<1x128xf32, #tpu.memory_space<vmem>>, vector<1x128xf32>
    %21 = vector.broadcast %20 : vector<1x128xf32> to vector<16x128xf32>
    %22 = arith.addf %19, %21 : vector<16x128xf32>
    %cst_15 = arith.constant dense<0.000000e+00> : vector<16xf32>
    %23 = vector.multi_reduction <add>, %22, %cst_15 [1] : vector<16x128xf32> to vector<16xf32>
    %24 = vector.shape_cast %23 : vector<16xf32> to vector<16x1xf32>
    %cst_16 = arith.constant 3.125000e-02 : f32
    %25 = vector.broadcast %cst_16 : f32 to vector<16x1xf32>
    %26 = arith.mulf %24, %25 : vector<16x1xf32>
    %27 = vector.broadcast %26 : vector<16x1xf32> to vector<16x128xf32>
    %28 = arith.subf %22, %27 : vector<16x128xf32>
    %c0_17 = arith.constant 0 : index
    %c0_18 = arith.constant 0 : index
    %29 = vector.load %arg10[%c0_17, %c0_18] : memref<1x128xf32, #tpu.memory_space<vmem>>, vector<1x128xf32>
    %30 = vector.broadcast %29 : vector<1x128xf32> to vector<16x128xf32>
    %31 = arith.mulf %28, %30 : vector<16x128xf32>
    %32 = arith.mulf %31, %31 : vector<16x128xf32>
    %cst_19 = arith.constant dense<0.000000e+00> : vector<16xf32>
    %33 = vector.multi_reduction <add>, %32, %cst_19 [1] : vector<16x128xf32> to vector<16xf32>
    %34 = vector.shape_cast %33 : vector<16xf32> to vector<16x1xf32>
    %cst_20 = arith.constant 3.125000e-02 : f32
    %35 = vector.broadcast %cst_20 : f32 to vector<16x1xf32>
    %36 = arith.mulf %34, %35 : vector<16x1xf32>
    %cst_21 = arith.constant 9.99999974E-6 : f32
    %37 = vector.broadcast %cst_21 : f32 to vector<16x1xf32>
    %38 = arith.addf %36, %37 : vector<16x1xf32>
    %39 = math.rsqrt %38 : vector<16x1xf32>
    %40 = vector.broadcast %39 : vector<16x1xf32> to vector<16x128xf32>
    %41 = arith.mulf %31, %40 : vector<16x128xf32>
    %c0_22 = arith.constant 0 : index
    %c0_23 = arith.constant 0 : index
    %42 = vector.load %arg8[%c0_22, %c0_23] : memref<1x128xf32, #tpu.memory_space<vmem>>, vector<1x128xf32>
    %43 = vector.broadcast %42 : vector<1x128xf32> to vector<16x128xf32>
    %44 = arith.mulf %41, %43 : vector<16x128xf32>
    %c0_24 = arith.constant 0 : index
    %c0_25 = arith.constant 0 : index
    %45 = vector.load %arg9[%c0_24, %c0_25] : memref<1x128xf32, #tpu.memory_space<vmem>>, vector<1x128xf32>
    %46 = vector.broadcast %45 : vector<1x128xf32> to vector<16x128xf32>
    %47 = arith.addf %44, %46 : vector<16x128xf32>
    %c0_26 = arith.constant 0 : index
    %c0_27 = arith.constant 0 : index
    %48 = vector.load %arg11[%c0_26, %c0_27] : memref<16x128xf32, #tpu.memory_space<vmem>>, vector<16x128xf32>
    tpu.vector_store %arg11[%c0_26, %c0_27], %47 {strides = array<i32>} : memref<16x128xf32, #tpu.memory_space<vmem>>, vector<16x128xf32>,
    return
  }
  func.func @transform_0(%arg0: i32) -> (i32, i32) {
    %c0_i32 = arith.constant 0 : i32
    %c0_i32_0 = arith.constant 0 : i32
    return %arg0, %c0_i32 : i32, i32
  }
  func.func @transform_1(%arg0: i32) -> (i32, i32) {
    %c0_i32 = arith.constant 0 : i32
    %c0_i32_0 = arith.constant 0 : i32
    %c0_i32_1 = arith.constant 0 : i32
    return %c0_i32, %c0_i32_0 : i32, i32
  }
  func.func @transform_2(%arg0: i32) -> (i32, i32) {
    %c0_i32 = arith.constant 0 : i32
    %c0_i32_0 = arith.constant 0 : i32
    %c0_i32_1 = arith.constant 0 : i32
    return %c0_i32, %c0_i32_0 : i32, i32
  }
  func.func @transform_3(%arg0: i32) -> (i32, i32) {
    %c0_i32 = arith.constant 0 : i32
    %c0_i32_0 = arith.constant 0 : i32
    %c0_i32_1 = arith.constant 0 : i32
    return %c0_i32, %c0_i32_0 : i32, i32
  }
  func.func @transform_4(%arg0: i32) -> (i32, i32) {
    %c0_i32 = arith.constant 0 : i32
    %c0_i32_0 = arith.constant 0 : i32
    %c0_i32_1 = arith.constant 0 : i32
    return %c0_i32, %c0_i32_0 : i32, i32
  }
  func.func @transform_5(%arg0: i32) -> (i32, i32) {
    %c0_i32 = arith.constant 0 : i32
    %c0_i32_0 = arith.constant 0 : i32
    %c0_i32_1 = arith.constant 0 : i32
    return %c0_i32, %c0_i32_0 : i32, i32
  }
  func.func @transform_6(%arg0: i32) -> (i32, i32) {
    %c0_i32 = arith.constant 0 : i32
    %c0_i32_0 = arith.constant 0 : i32
    %c0_i32_1 = arith.constant 0 : i32
    return %c0_i32, %c0_i32_0 : i32, i32
  }
  func.func @transform_7(%arg0: i32) -> (i32, i32) {
    %c0_i32 = arith.constant 0 : i32
    %c0_i32_0 = arith.constant 0 : i32
    %c0_i32_1 = arith.constant 0 : i32
    return %c0_i32, %c0_i32_0 : i32, i32
  }
  func.func @transform_8(%arg0: i32) -> (i32, i32) {
    %c0_i32 = arith.constant 0 : i32
    %c0_i32_0 = arith.constant 0 : i32
    %c0_i32_1 = arith.constant 0 : i32
    return %c0_i32, %c0_i32_0 : i32, i32
  }
  func.func @transform_9(%arg0: i32) -> (i32, i32) {
    %c0_i32 = arith.constant 0 : i32
    %c0_i32_0 = arith.constant 0 : i32
    %c0_i32_1 = arith.constant 0 : i32
    return %c0_i32, %c0_i32_0 : i32, i32
  }
  func.func @transform_10(%arg0: i32) -> (i32, i32) {
    %c0_i32 = arith.constant 0 : i32
    %c0_i32_0 = arith.constant 0 : i32
    return %arg0, %c0_i32 : i32, i32
  }
}

</mosaic_0001>

<bundles_post_ra>
// kernel: scalar_encoder.1
= control target key start
LH: loop header
LB: loop body
LE: loop exit
PB: predicated region body
PF: predicated region fallthrough
CT: control target
= control target key end

     0   :  { %15 = vsyncpa [#allocation3], 0  ;;  %s1077_s0 = inlined_call_operand.vmem [shape: f32[16,1], index: 0, kind: input, shape index: {}]   ;;  %s1078_s1 = inlined_call_operand.vmem [shape: f32[1,128], index: 1, kind: input, shape index: {}]   ;;  %s1079_s2 = inlined_call_operand.vmem [shape: f32[1,128], index: 2, kind: input, shape index: {}]   ;;  %s1080_s3 = inlined_call_operand.hbm [shape: bf16[128,128], index: 3, kind: input, shape index: {}]   ;;  %s1081_s4 = inlined_call_operand.vmem [shape: f32[1,128], index: 4, kind: input, shape index: {}]   ;;  %s1082_s5 = inlined_call_operand.hbm [shape: bf16[128,128], index: 5, kind: input, shape index: {}]   ;;  %s1083_s6 = inlined_call_operand.vmem [shape: f32[1,128], index: 6, kind: input, shape index: {}]   ;;  %s1084_s7 = inlined_call_operand.vmem [shape: f32[1,128], index: 7, kind: input, shape index: {}]   ;;  %s1085_s8 = inlined_call_operand.vmem [shape: f32[1,128], index: 8, kind: input, shape index: {}]   ;;  %s1086_s9 = inlined_call_operand.vmem [shape: f32[1,128], index: 9, kind: input, shape index: {}]   ;;  %s1087_s10 = inlined_call_operand.vmem [shape: f32[16,128], index: 10, kind: output, shape index: {}]  }
   0x1   :  { %s27_s15 = sshll.u32 %s1080_s3, 4  ;;  %s28_s15 = int_to_ptr.hbm [resolvable:$true] %s27_s15 }
   0x2   :  { %16 = vsyncpa [#allocation5], 0  ;;  %s794_s16 = smov [#allocation2]   ;;  %s42_s20 = sshll.u32 %s1082_s5, 4  ;;  %s43_s20 = int_to_ptr.hbm [resolvable:$true] %s42_s20 }
   0x3   :  { %s29_s17 = sshll.u32 %s794_s16, 4  ;;  %s795_s21 = smov 64   ;;  %s30_s17 = int_to_ptr.vmem [resolvable:$true] %s29_s17 }
   0x4   :  { %s796_s22 = smov 4   ;;  %s797_s23 = smov [#allocation4]  }
   0x5   :  { %35 = dma.hbm_to_vmem [thread:$0]  %s28_s15, 1024, %s30_s17, [#allocation3], %s795_s21, %s795_s21, %s796_s22  }
   0x6   :  { %s44_s24 = sshll.u32 %s797_s23, 4  ;;  %s45_s24 = int_to_ptr.vmem [resolvable:$true] %s44_s24 }
   0x7   :  { %50 = dma.hbm_to_vmem [thread:$0]  %s43_s20, 1024, %s45_s24, [#allocation5], %s795_s21, %s795_s21, %s796_s22  }
   0x8   :  { %790 = dma.done.wait [#allocation3], 1024  }
   0x9   :  { %791 = vsyncadd [#allocation3], 4294966272 }
   0xa   :  { %792 = dma.done.wait [#allocation5], 1024  }
   0xb   :  { %793 = vsyncadd [#allocation5], 4294966272  ;;  %v798_v0 = vmov 0   ;;  %v67_v1 = vld [vmem:[%s1077_s0] sm:$0xff]  ;;  %v68_v2 = vld [vmem:[%s1077_s0 + $0x8] sm:$0xff] }
   0xc   :  { %730 = vset.pattern.permute.xlu0 %v798_v0  ;;  %v731_v3 = vld [vmem:[%s1078_s1] ss:$0 sm:$0xff]  ;;  %v710_v6 = vld [vmem:[#allocation2 + $0x38] sm:$0xff]  ;;  %v709_v8 = vld [vmem:[#allocation2 + $0x30] sm:$0xff]  ;;  %v799_v32 = vmov 2102212464  }
   0xd   :  { %75 = vperm.xlu0 %730, %v67_v1   ;;  %v732_v4 = vld [vmem:[%s1079_s2] ss:$0 sm:$0xff]  ;;  %468 = vmatpush.bf16.msra.mxu0 %v710_v6  ;;  %v708_v12 = vld [vmem:[#allocation2 + $0x28] sm:$0xff]  ;;  %v706_v25 = vld [vmem:[#allocation2 + $0x18] sm:$0xff]  ;;  %v800_v34 = vmov 920167782  }
   0xe   :  { %v707_v19 = vld [vmem:[#allocation2 + $0x20] sm:$0xff]  ;;  %v705_v37 = vld [vmem:[#allocation2 + $0x10] sm:$0xff]  ;;  %v801_v38 = vmov 683565275   ;;  %v802_v41 = vmov 1326507024  }
   0xf   :  { %v803_v43 = vmov 2475754826   ;;  %v804_v47 = vmov 2131351028   ;;  %v704_v54 = vld [vmem:[#allocation2 + $0x8] sm:$0xff] }
  0x11   :  { %469 = vmatpush.bf16.msra.mxu0 %v709_v8 }
  0x15   :  { %80 = vperm.xlu0 %730, %v68_v2   ;;  %470 = vmatpush.bf16.msra.mxu0 %v708_v12 }
  0x19   :  { %471 = vmatpush.bf16.msra.mxu0 %v707_v19 }
  0x1d   :  { %472 = vmatpush.bf16.msra.mxu0 %v706_v25 }
  0x21   :  { %473 = vmatpush.bf16.msra.mxu0 %v705_v37 }
  0x25   :  { %474 = vmatpush.bf16.msra.mxu0 %v704_v54 }
  0x7f   :  { %v76_v5 = vpop.permute.xlu0 %75 }
  0x80   :  { %v83_v7 = vmul.f32 %v731_v3, %v76_v5 }
  0x82   :  { %v879_v9 = vadd.f32 %v732_v4, %v83_v7  ;;  %v703_v7 = vld [vmem:[#allocation2] sm:$0xff] }
  0x83   :  { %475 = vmatpush.bf16.msra.mxu0 %v703_v7 }
  0x84   :  { %v94_v10 = vand.u32 2139095040, %v879_v9  ;;  %v91_v11 = vand.u32 2147483647, %v879_v9 }
  0x86   :  { %v95_v13 = vshrl.u32 %v94_v10, 23  ;;  %v98_v14 = vand.u32 8388607, %v91_v11 }
  0x87   :  { %v81_v15 = vpop.permute.xlu0 %80 }
  0x88   :  { %v633_v16 = vadd.s32 4294967169, %v95_v13  ;;  %v84_v17 = vmul.f32 %v731_v3, %v81_v15  ;;  %v99_v18 = vor.u32 8388608, %v98_v14 }
  0x8a   :  { %v101_v20 = vadd.s32 1, %v633_v16  ;;  %v885_v21 = vadd.f32 %v732_v4, %v84_v17  ;;  %v888_v23 = vshll.u32 %v99_v18, 8 }
  0x8c   :  { %vm102_vm0 = vcmp.gt.s32.totalorder %v101_v20, 0  ;;  %v248_v22 = vand.u32 2139095040, %v885_v21  ;;  %v893_v30 = vand.u32 65535, %v888_v23  ;;  %v245_v31 = vand.u32 2147483647, %v885_v21 }
  0x8d   :  { %v103_v24 = vsel %vm102_vm0, %v101_v20, 0  ;;  %v141_v19 = vshrl.u32 %v888_v23, 16 }
  0x8e   :  { %v105_v26 = vand.u32 31, %v103_v24  ;;  %v249_v27 = vshrl.u32 %v248_v22, 23  ;;  %v890_v28 = vshrl.u32 %v103_v24, 5  ;;  %v911_v4 = vand.u32 8388607, %v245_v31 }
  0x90   :  { %v106_v29 = vsub.s32 32, %v105_v26  ;;  %v117_v33 = vshll.u32 %v799_v32, %v105_v26  ;;  %v120_v35 = vshll.u32 %v800_v34, %v105_v26  ;;  %v636_v36 = vadd.s32 4294967169, %v249_v27 }
  0x91   :  { %v108_v39 = vshll.u32 %v801_v38, %v105_v26  ;;  %v111_v45 = vshll.u32 %v803_v43, %v105_v26  ;;  %v114_v49 = vshll.u32 %v804_v47, %v105_v26  ;;  %vm126_vm1 = vcmp.lt.s32.totalorder %v890_v28, 4 }
  0x92   :  { %v118_v40 = vshrl.u32 %v800_v34, %v106_v29  ;;  %v121_v42 = vshrl.u32 %v802_v41, %v106_v29  ;;  %v109_v44 = vshrl.u32 %v803_v43, %v106_v29  ;;  %v255_v46 = vadd.s32 1, %v636_v36 }
  0x93   :  { %v112_v48 = vshrl.u32 %v804_v47, %v106_v29  ;;  %v115_v50 = vshrl.u32 %v799_v32, %v106_v29  ;;  %v107_v55 = vshrl.u32 %v801_v38, %v106_v29  ;;  %vm123_vm3 = vcmp.lt.s32.totalorder %v890_v28, 1 }
  0x94   :  { %v119_v51 = vor.u32 %v118_v40, %v117_v33  ;;  %v122_v52 = vor.u32 %v121_v42, %v120_v35  ;;  %v110_v53 = vor.u32 %v109_v44, %v108_v39  ;;  %vm256_vm2 = vcmp.gt.s32.totalorder %v255_v46, 0 }
  0x95   :  { %v113_v56 = vor.u32 %v112_v48, %v111_v45  ;;  %v116_v57 = vor.u32 %v115_v50, %v114_v49  ;;  %v257_v60 = vsel %vm256_vm2, %v255_v46, 0  ;;  %vm125_vm4 = vcmp.lt.s32.totalorder %v890_v28, 3 }
  0x96   :  { %v132_v58 = vsel %vm126_vm1, %v119_v51, 920167782  ;;  %v136_v59 = vsel %vm126_vm1, %v122_v52, 1326507024  ;;  %v906_v61 = vand.u32 31, %v257_v60  ;;  %v913_v5 = vshrl.u32 %v257_v60, 5 }
  0x97   :  { %v128_v62 = vsel %vm126_vm1, %v116_v57, 2102212464  ;;  %v131_v63 = vsel %vm123_vm3, %v110_v53, %v113_v56  ;;  %v133_v1 = vsel %vm125_vm4, %v116_v57, %v132_v58  ;;  %v135_v2 = vsel %vm123_vm3, %v113_v56, %v116_v57 }
  0x98   :  { %v137_v3 = vsel %vm125_vm4, %v119_v51, %v136_v59  ;;  %v916_v6 = vsub.s32 32, %v906_v61  ;;  %vm124_vm5 = vcmp.lt.s32.totalorder %v890_v28, 2  ;;  %v127_v8 = vsel %vm123_vm3, %v107_v55, %v110_v53 }
  0x99   :  { %v274_v10 = vshll.u32 %v800_v34, %v906_v61  ;;  %v129_v12 = vsel %vm125_vm4, %v113_v56, %v128_v62  ;;  %v134_v13 = vsel %vm124_vm5, %v131_v63, %v133_v1  ;;  %v138_v14 = vsel %vm124_vm5, %v135_v2, %v137_v3 }
  0x9a   :  { %v272_v15 = vshrl.u32 %v800_v34, %v916_v6  ;;  %v275_v16 = vshrl.u32 %v802_v41, %v916_v6  ;;  %v142_v17 = vand.u32 65535, %v138_v14  ;;  %v143_v18 = vshrl.u32 %v138_v14, 16 }
  0x9b   :  { %v164_v20 = vand.u32 65535, %v134_v13  ;;  %v165_v22 = vshrl.u32 %v134_v13, 16  ;;  %v271_v24 = vshll.u32 %v799_v32, %v906_v61  ;;  %vm280_vm6 = vcmp.lt.s32.totalorder %v913_v5, 4 }
  0x9c   :  { %v276_v25 = vor.u32 %v275_v16, %v274_v10  ;;  %v145_v26 = vmul.u32 %v143_v18, %v893_v30  ;;  %v933_v27 = vsel %vm124_vm5, %v127_v8, %v129_v12  ;;  %v146_v29 = vmul.u32 %v142_v17, %v141_v19 }
  0x9d   :  { %v167_v33 = vmul.u32 %v165_v22, %v893_v30  ;;  %v253_v34 = vor.u32 8388608, %v911_v4  ;;  %v273_v35 = vor.u32 %v272_v15, %v271_v24  ;;  %v144_v36 = vmul.u32 %v142_v17, %v893_v30 }
  0x9e   :  { %v147_v37 = vmul.u32 %v143_v18, %v141_v19  ;;  %v148_v39 = vshll.u32 %v145_v26, 16  ;;  %v290_v40 = vsel %vm280_vm6, %v276_v25, 1326507024  ;;  %v149_v41 = vshrl.u32 %v145_v26, 16 }
  0x9f   :  { %v166_v42 = vmul.u32 %v164_v20, %v893_v30  ;;  %v168_v44 = vmul.u32 %v164_v20, %v141_v19  ;;  %v150_v28 = vshll.u32 %v146_v29, 16  ;;  %v170_v46 = vshll.u32 %v167_v33, 16 }
  0xa0   :  { %vm152_vm7 = vc.u32 %v144_v36, %v148_v39  ;;  %v154_v45 = vadd.s32 %v148_v39, %v144_v36  ;;  %v151_v48 = vshrl.u32 %v146_v29, 16  ;;  %v169_v50 = vmul.u32 %v165_v22, %v141_v19 }
  0xa1   :  { %v153_v49 = vsel %vm152_vm7, 1, %v798_v0  ;;  %v172_v51 = vshll.u32 %v168_v44, 16  ;;  %vm174_vm9 = vc.u32 %v166_v42, %v170_v46  ;;  %v176_v53 = vadd.s32 %v170_v46, %v166_v42 }
  0xa2   :  { %v155_v52 = vadd.s32 %v153_v49, %v147_v37  ;;  %vm156_vm8 = vc.u32 %v154_v45, %v150_v28  ;;  %v175_v55 = vsel %vm174_vm9, 1, %v798_v0  ;;  %v262_v30 = vshll.u32 %v801_v38, %v906_v61 }
  0xa3   :  { %v157_v54 = vsel %vm156_vm8, 1, %v798_v0  ;;  %v263_v56 = vshrl.u32 %v803_v43, %v916_v6  ;;  %v171_v58 = vshrl.u32 %v167_v33, 16  ;;  %v177_v59 = vadd.s32 %v175_v55, %v169_v50 }
  0xa4   :  { %v159_v57 = vadd.s32 %v157_v54, %v155_v52  ;;  %vm178_vm10 = vc.u32 %v176_v53, %v172_v51  ;;  %v265_v63 = vshll.u32 %v803_v43, %v906_v61  ;;  %v266_v1 = vshrl.u32 %v804_v47, %v916_v6 }
  0xa5   :  { %v179_v60 = vsel %vm178_vm10, 1, %v798_v0  ;;  %v949_v62 = vor.u32 %v263_v56, %v262_v30  ;;  %v268_v4 = vshll.u32 %v804_v47, %v906_v61  ;;  %v269_v7 = vshrl.u32 %v799_v32, %v916_v6 }
  0xa6   :  { %v160_v2 = vadd.s32 %v159_v57, %v149_v41  ;;  %v181_v3 = vadd.s32 %v179_v60, %v177_v59  ;;  %v286_v8 = vsel %vm280_vm6, %v273_v35, 920167782  ;;  %v173_v10 = vshrl.u32 %v168_v44, 16 }
  0xa7   :  { %v961_v12 = vor.u32 %v266_v1, %v265_v63  ;;  %vm277_vm11 = vcmp.lt.s32.totalorder %v913_v5, 1  ;;  %v270_v14 = vor.u32 %v269_v7, %v268_v4  ;;  %vm279_vm12 = vcmp.lt.s32.totalorder %v913_v5, 3 }
  0xa8   :  { %v964_v43 = vadd.s32 %v160_v2, %v151_v48  ;;  %v182_v13 = vadd.s32 %v181_v3, %v171_v58  ;;  %v967_v15 = vadd.s32 %v176_v53, %v172_v51  ;;  %v291_v47 = vsel %vm279_vm12, %v273_v35, %v290_v40 }
  0xa9   :  { %v285_v32 = vsel %vm277_vm11, %v949_v62, %v961_v12  ;;  %v975_v61 = vshll.u32 %v253_v34, 8  ;;  %v184_v17 = vmul.u32 %v888_v23, %v933_v27  ;;  %vm278_vm14 = vcmp.lt.s32.totalorder %v913_v5, 2 }
  0xaa   :  { %v183_v16 = vadd.s32 %v182_v13, %v173_v10  ;;  %vm186_vm13 = vc.u32 %v964_v43, %v967_v15  ;;  %v287_v18 = vsel %vm279_vm12, %v270_v14, %v286_v8  ;;  %v289_v19 = vsel %vm277_vm11, %v961_v12, %v270_v14 }
  0xab   :  { %v288_v22 = vsel %vm278_vm14, %v285_v32, %v287_v18  ;;  %v292_v24 = vsel %vm278_vm14, %v289_v19, %v291_v47  ;;  %v294_v23 = vand.u32 65535, %v975_v61  ;;  %v295_v25 = vshrl.u32 %v975_v61, 16 }
  0xac   :  { %v187_v20 = vadd.s32 1, %v183_v16  ;;  %v296_v26 = vand.u32 65535, %v292_v24  ;;  %v297_v27 = vshrl.u32 %v292_v24, 16  ;;  %v318_v29 = vand.u32 65535, %v288_v22 }
  0xad   :  { %v319_v34 = vshrl.u32 %v288_v22, 16  ;;  %v282_v1 = vsel %vm280_vm6, %v270_v14, 2102212464  ;;  %v261_v4 = vshrl.u32 %v801_v38, %v916_v6  ;;  %vm93_vm7 = vcmp.lt.s32.totalorder %v879_v9, 0 }
  0xae   :  { %v188_v33 = vsel %vm186_vm13, %v187_v20, %v183_v16  ;;  %v299_v36 = vmul.u32 %v297_v27, %v294_v23  ;;  %v300_v37 = vmul.u32 %v296_v26, %v295_v25  ;;  %v322_v40 = vmul.u32 %v318_v29, %v295_v25 }
  0xaf   :  { %v189_v35 = vadd.s32 %v188_v33, %v184_v17  ;;  %v321_v39 = vmul.u32 %v319_v34, %v294_v23  ;;  %v298_v42 = vmul.u32 %v296_v26, %v294_v23  ;;  %v301_v28 = vmul.u32 %v297_v27, %v295_v25 }
  0xb0   :  { %v302_v44 = vshll.u32 %v299_v36, 16  ;;  %v320_v45 = vmul.u32 %v318_v29, %v294_v23  ;;  %v304_v49 = vshll.u32 %v300_v37, 16  ;;  %v326_v52 = vshll.u32 %v322_v40, 16 }
  0xb1   :  { %v190_v41 = vadd.s32 536870912, %v189_v35  ;;  %v324_v46 = vshll.u32 %v321_v39, 16  ;;  %v323_v30 = vmul.u32 %v319_v34, %v295_v25  ;;  %v303_v59 = vshrl.u32 %v299_v36, 16 }
  0xb2   :  { %vm306_vm15 = vc.u32 %v298_v42, %v302_v44  ;;  %v308_v50 = vadd.s32 %v302_v44, %v298_v42  ;;  %v305_v8 = vshrl.u32 %v300_v37, 16  ;;  %v325_v10 = vshrl.u32 %v321_v39, 16 }
  0xb3   :  { %v993_v48 = vshrl.u32 %v190_v41, 30  ;;  %v307_v51 = vsel %vm306_vm15, 1, %v798_v0  ;;  %vm328_vm0 = vc.u32 %v320_v45, %v324_v46  ;;  %v330_v53 = vadd.s32 %v324_v46, %v320_v45 }
  0xb4   :  { %v309_v55 = vadd.s32 %v307_v51, %v301_v28  ;;  %vm310_vm1 = vc.u32 %v308_v50, %v304_v49  ;;  %v329_v57 = vsel %vm328_vm0, 1, %v798_v0  ;;  %v281_v47 = vsel %vm277_vm11, %v261_v4, %v949_v62  ;;  %v718_v4 = vld [vmem:[#allocation4 + $0x38] sm:$0xff] }
  0xb5   :  { %v192_v54 = vshll.u32 %v993_v48, 30  ;;  %v311_v56 = vsel %vm310_vm1, 1, %v798_v0  ;;  %vm332_vm2 = vc.u32 %v330_v53, %v326_v52  ;;  %v331_v63 = vadd.s32 %v329_v57, %v323_v30  ;;  %553 = vmatpush.bf16.msra.mxu1 %v718_v4 }
  0xb6   :  { %v313_v60 = vadd.s32 %v311_v56, %v309_v55  ;;  %v333_v2 = vsel %vm332_vm2, 1, %v798_v0  ;;  %v283_v14 = vsel %vm279_vm12, %v961_v12, %v282_v1  ;;  %v327_v17 = vshrl.u32 %v322_v40, 16 }
  0xb7   :  { %v193_v58 = vsub.s32 %v189_v35, %v192_v54  ;;  %v335_v13 = vadd.s32 %v333_v2, %v331_v63  ;;  %v334_v19 = vadd.s32 %v330_v53, %v326_v52  ;;  %v284_v38 = vsel %vm278_vm14, %v281_v47, %v283_v14 }
  0xb8   :  { %v314_v7 = vadd.s32 %v313_v60, %v303_v59  ;;  %v338_v62 = vmul.u32 %v975_v61, %v284_v38  ;;  %v185_v23 = vadd.s32 %v967_v15, %v964_v43  ;;  %vm1021_vm8 = vcmp.le.f32.partialorder %v91_v11, 0.7853982 }
  0xb9   :  { %vm194_vm3 = vcmp.lt.s32.totalorder %v193_v58, 0  ;;  %v195_v3 = vsub.s32 0, %v193_v58  ;;  %v336_v18 = vadd.s32 %v335_v13, %v325_v10  ;;  %v717_v13 = vld [vmem:[#allocation4 + $0x30] sm:$0xff]  ;;  %vm247_vm10 = vcmp.lt.s32.totalorder %v885_v21, 0 }
  0xba   :  { %v315_v0 = vadd.s32 %v314_v7, %v305_v8  ;;  %554 = vmatpush.bf16.msra.mxu1 %v717_v13  ;;  %vm1033_vm11 = vcmp.le.f32.partialorder %v245_v31, 0.7853982  ;;  %vm234_vm2 = vweird.f32 %v879_v9 }
  0xbb   :  { %v196_v32 = vsel %vm194_vm3, %v195_v3, %v193_v58  ;;  %v337_v6 = vadd.s32 %v336_v18, %v327_v17  ;;  %vm388_vm3 = vweird.f32 %v885_v21 }
  0xbc   :  { %v197_v16 = vclz %v196_v32  ;;  %vm340_vm4 = vc.u32 %v315_v0, %v334_v19  ;;  %v339_v55 = vadd.s32 %v334_v19, %v315_v0  ;;  %v716_v0 = vld [vmem:[#allocation4 + $0x28] sm:$0xff] }
  0xbd   :  { %v341_v22 = vadd.s32 1, %v337_v6 }
  0xbe   :  { %v634_v20 = vadd.s32 4294967294, %v197_v16  ;;  %555 = vmatpush.bf16.msra.mxu1 %v716_v0 }
  0xbf   :  { %v342_v26 = vsel %vm340_vm4, %v341_v22, %v337_v6 }
  0xc0   :  { %vm635_vm5 = vcmp.lt.s32.totalorder %v634_v20, 0  ;;  %v343_v27 = vadd.s32 %v342_v26, %v338_v62 }
  0xc1   :  { %v200_v24 = vsel %vm635_vm5, 0, %v634_v20  ;;  %v215_v20 = vsub.s32 4, %v993_v48 }
  0xc2   :  { %v201_v12 = vsub.s32 32, %v200_v24  ;;  %v205_v25 = vsub.s32 4294967266, %v200_v24  ;;  %v202_v29 = vshll.u32 %v193_v58, %v200_v24  ;;  %v344_v35 = vadd.s32 536870912, %v343_v27  ;;  %v715_v24 = vld [vmem:[#allocation4 + $0x20] sm:$0xff] }
  0xc3   :  { %v216_v31 = vsel %vm93_vm7, %v215_v20, %v993_v48  ;;  %556 = vmatpush.bf16.msra.mxu1 %v715_v24 }
  0xc4   :  { %v203_v33 = vshrl.u32 %v185_v23, %v201_v12  ;;  %v206_v34 = vadd.s32 127, %v205_v25  ;;  %v1015_v37 = vshrl.u32 %v344_v35, 30 }
  0xc6   :  { %v204_v5 = vor.u32 %v203_v33, %v202_v29  ;;  %v207_v36 = vshll.u32 %v206_v34, 23  ;;  %v346_v40 = vshll.u32 %v1015_v37, 30  ;;  %v369_v25 = vsub.s32 4, %v1015_v37 }
  0xc7   :  { %v218_v33 = vsel %vm1021_vm8, 0, %v216_v31 }
  0xc8   :  { %v208_v39 = vor.u32 4788187, %v207_v36  ;;  %v211_v61 = vcvt.s32.f32 %v204_v5  ;;  %v347_v42 = vsub.s32 %v343_v27, %v346_v40  ;;  %v370_v36 = vsel %vm247_vm10, %v369_v25, %v1015_v37 }
  0xc9   :  { %v235_v48 = vand.u32 3, %v218_v33 }
  0xca   :  { %v209_v41 = vand.u32 2147483647, %v208_v39  ;;  %vm348_vm6 = vcmp.lt.s32.totalorder %v347_v42, 0  ;;  %v349_v43 = vsub.s32 0, %v347_v42 }
  0xcb   :  { %vm237_vm12 = vcmp.eq.s32.totalorder %v235_v48, 0  ;;  %vm240_vm13 = vcmp.eq.s32.totalorder %v235_v48, 2  ;;  %vm236_vm14 = vcmp.lt.s32.totalorder %v235_v48, 2 }
  0xcc   :  { %v212_v44 = vmul.f32 %v211_v61, %v209_v41  ;;  %v350_v28 = vsel %vm348_vm6, %v349_v43, %v347_v42 }
  0xcd   :  { %v351_v49 = vclz %v350_v28 }
  0xce   :  { %v213_v15 = vxor.u32 2147483648, %v212_v44 }
  0xcf   :  { %v637_v52 = vadd.s32 4294967294, %v351_v49 }
  0xd0   :  { %v214_v46 = vsel %vm93_vm7, %v213_v15, %v212_v44 }
  0xd1   :  { %v217_v50 = vsel %vm1021_vm8, %v879_v9, %v214_v46  ;;  %vm638_vm9 = vcmp.lt.s32.totalorder %v637_v52, 0  ;;  %v733_v9 = vld [vmem:[%s1081_s4] ss:$0 sm:$0xff] }
  0xd2   :  { %v219_v51 = vmul.f32 %v217_v50, %v217_v50  ;;  %v354_v54 = vsel %vm638_vm9, 0, %v637_v52 }
  0xd3   :  { %v355_v30 = vsub.s32 32, %v354_v54  ;;  %v359_v56 = vsub.s32 4294967266, %v354_v54  ;;  %v356_v58 = vshll.u32 %v347_v42, %v354_v54  ;;  %v372_v42 = vsel %vm1033_vm11, 0, %v370_v36 }
  0xd4   :  { %v227_v53 = vmul.f32 -0.00019511016, %v219_v51  ;;  %v220_v60 = vmul.f32 -0.001358992, %v219_v51  ;;  %v389_v46 = vand.u32 3, %v372_v42 }
  0xd5   :  { %v357_v11 = vshrl.u32 %v339_v55, %v355_v30  ;;  %v360_v59 = vadd.s32 127, %v359_v56  ;;  %v737_v42 = vld [vmem:[%s1085_s8] ss:$0 sm:$0xff] }
  0xd6   :  { %v228_v57 = vadd.f32 0.008332121, %v227_v53  ;;  %v221_v7 = vadd.f32 0.041655596, %v220_v60  ;;  %vm391_vm15 = vcmp.eq.s32.totalorder %v389_v46, 0  ;;  %vm394_vm0 = vcmp.eq.s32.totalorder %v389_v46, 2 }
  0xd7   :  { %v358_v63 = vor.u32 %v357_v11, %v356_v58  ;;  %v361_v1 = vshll.u32 %v360_v59, 23  ;;  %vm390_vm1 = vcmp.lt.s32.totalorder %v389_v46, 2  ;;  %v714_v58 = vld [vmem:[#allocation4 + $0x18] sm:$0xff]  ;;  %v713_v59 = vld [vmem:[#allocation4 + $0x10] sm:$0xff]  ;;  %v712_v60 = vld [vmem:[#allocation4 + $0x8] sm:$0xff] }
  0xd8   :  { %v229_v2 = vmul.f32 %v228_v57, %v219_v51  ;;  %v222_v14 = vmul.f32 %v221_v7, %v219_v51  ;;  %557 = vmatpush.bf16.msra.mxu1 %v714_v58 }
  0xd9   :  { %v362_v3 = vor.u32 4788187, %v361_v1  ;;  %v365_v10 = vcvt.s32.f32 %v358_v63  ;;  %v711_v63 = vld [vmem:[#allocation4] sm:$0xff] }
  0xda   :  { %v230_v32 = vadd.f32 -0.16666654, %v229_v2  ;;  %v223_v6 = vadd.f32 -0.4999988, %v222_v14 }
  0xdb   :  { %v363_v8 = vand.u32 2147483647, %v362_v3 }
  0xdc   :  { %v231_v17 = vmul.f32 %v230_v32, %v219_v51  ;;  %v224_v26 = vmul.f32 %v223_v6, %v219_v51  ;;  %558 = vmatpush.bf16.msra.mxu1 %v713_v59 }
  0xdd   :  { %v366_v47 = vmul.f32 %v365_v10, %v363_v8  ;;  %v734_v10 = vld [vmem:[%s1083_s6] ss:$0 sm:$0xff] }
  0xde   :  { %v232_v62 = vadd.f32 1.0, %v231_v17  ;;  %v225_v39 = vadd.f32 1.0, %v224_v26  ;;  %v735_v17 = vld [vmem:[%s1086_s9] ss:$0 sm:$0xff] }
  0xdf   :  { %v367_v16 = vxor.u32 2147483648, %v366_v47 }
  0xe0   :  { %v233_v34 = vmul.f32 %v232_v62, %v217_v50  ;;  %v241_v15 = vxor.u32 2147483648, %v225_v39  ;;  %559 = vmatpush.bf16.msra.mxu1 %v712_v60 }
  0xe1   :  { %v368_v19 = vsel %vm247_vm10, %v367_v16, %v366_v47 }
  0xe2   :  { %v371_v38 = vsel %vm1033_vm11, %v885_v21, %v368_v19  ;;  %v238_v61 = vxor.u32 2147483648, %v233_v34  ;;  %v242_v37 = vsel %vm240_vm13, %v241_v15, %v233_v34 }
  0xe3   :  { %v373_v22 = vmul.f32 %v371_v38, %v371_v38 }
  0xe4   :  { %v239_v49 = vsel %vm237_vm12, %v225_v39, %v238_v61  ;;  %560 = vmatpush.bf16.msra.mxu1 %v711_v63 }
  0xe5   :  { %v374_v23 = vmul.f32 -0.001358992, %v373_v22  ;;  %v381_v12 = vmul.f32 -0.00019511016, %v373_v22  ;;  %v243_v53 = vsel %vm236_vm14, %v239_v49, %v242_v37 }
  0xe6   :  { %v244_v56 = vsel %vm234_vm2, nan, %v243_v53 }
  0xe7   :  { %v375_v27 = vadd.f32 0.041655596, %v374_v23  ;;  %v382_v29 = vadd.f32 0.008332121, %v381_v12 }
  0xe9   :  { %v376_v35 = vmul.f32 %v375_v27, %v373_v22  ;;  %v383_v5 = vmul.f32 %v382_v29, %v373_v22 }
  0xeb   :  { %v377_v40 = vadd.f32 -0.4999988, %v376_v35  ;;  %v384_v41 = vadd.f32 -0.16666654, %v383_v5 }
  0xed   :  { %v378_v44 = vmul.f32 %v377_v40, %v373_v22  ;;  %v385_v43 = vmul.f32 %v384_v41, %v373_v22  ;;  %v736_v41 = vld [vmem:[%s1084_s7] ss:$0 sm:$0xff] }
  0xef   :  { %v379_v28 = vadd.f32 1.0, %v378_v44  ;;  %v386_v45 = vadd.f32 1.0, %v385_v43 }
  0xf1   :  { %v387_v50 = vmul.f32 %v386_v45, %v371_v38  ;;  %v395_v51 = vxor.u32 2147483648, %v379_v28 }
  0xf3   :  { %v392_v52 = vxor.u32 2147483648, %v387_v50  ;;  %v396_v55 = vsel %vm394_vm0, %v395_v51, %v387_v50 }
  0xf5   :  { %v393_v54 = vsel %vm391_vm15, %v379_v28, %v392_v52 }
  0xf6   :  { %v397_v30 = vsel %vm390_vm1, %v393_v54, %v396_v55 }
  0xf7   :  { %v398_v11 = vsel %vm388_vm3, nan, %v397_v30 }
  0xf8   :  { %v399_v57 = vpack.c.bf16 %v398_v11, %v244_v56 }
  0xfa   :  { %476 = vmatmul.bf16.vlgmr.msra.gmra.mxu0 %v399_v57 }
 0x177   :  { %v477_v1 = vpop.f32.mrf.mxu0 }
 0x178   :  { %v478_v2 = vadd.f32 %v733_v9, %v477_v1 }
 0x17a   :  { %v482_v4 = vmax.f32 %v478_v2, 0.0 }
 0x17f   :  { %v479_v21 = vpop.f32.mrf.mxu0 }
 0x180   :  { %v480_v3 = vadd.f32 %v733_v9, %v479_v21 }
 0x182   :  { %v483_v7 = vmax.f32 %v480_v3, 0.0 }
 0x184   :  { %v484_v8 = vpack.c.bf16 %v483_v7, %v482_v4 }
 0x186   :  { %561 = vmatmul.bf16.vlgmr.msra.gmra.mxu1 %v484_v8 }
 0x203   :  { %v562_v13 = vpop.f32.mrf.mxu1 }
 0x204   :  { %v563_v32 = vadd.f32 %v734_v10, %v562_v13 }
 0x206   :  { %567 = vadd.xlane.f32.xlu1 %v563_v32 }
 0x20b   :  { %v564_v47 = vpop.f32.mrf.mxu1 }
 0x20c   :  { %v565_v14 = vadd.f32 %v734_v10, %v564_v47 }
 0x20e   :  { %569 = vadd.xlane.f32.xlu1 %v565_v14 }
 0x279   :  { %v568_v16 = vpop.xlane.xlu1 %567 }
 0x27a   :  { %v571_v0 = vmul.f32 0.03125, %v568_v16 }
 0x27c   :  { %v573_v18 = vsub.f32 %v563_v32, %v571_v0 }
 0x27e   :  { %v579_v19 = vmul.f32 %v735_v17, %v573_v18 }
 0x280   :  { %v581_v20 = vmul.f32 %v579_v19, %v579_v19 }
 0x281   :  { %v570_v38 = vpop.xlane.xlu1 %569 }
 0x282   :  { %v572_v6 = vmul.f32 0.03125, %v570_v38  ;;  %583 = vadd.xlane.f32.xlu2 %v581_v20 }
 0x284   :  { %v574_v22 = vsub.f32 %v565_v14, %v572_v6 }
 0x286   :  { %v580_v24 = vmul.f32 %v735_v17, %v574_v22 }
 0x288   :  { %v582_v62 = vmul.f32 %v580_v24, %v580_v24 }
 0x28a   :  { %585 = vadd.xlane.f32.xlu2 %v582_v62 }
 0x2f5   :  { %v584_v23 = vpop.xlane.xlu2 %583 }
 0x2f6   :  { %v587_v12 = vmul.f32 0.03125, %v584_v23 }
 0x2f8   :  { %v589_v31 = vadd.f32 1e-05, %v587_v12 }
 0x2fa   :  { %738 = vrsqrt.f32 %v589_v31  ;;  %vm597_vm5 = vweird.f32 %v589_v31 }
 0x2fd   :  { %v586_v25 = vpop.xlane.xlu2 %585 }
 0x2fe   :  { %v588_v26 = vmul.f32 0.03125, %v586_v25 }
 0x300   :  { %v739_v27 = vpop.eup %738  ;;  %v590_v29 = vadd.f32 1e-05, %v588_v26 }
 0x301   :  { %v592_v33 = vmul.f32 %v739_v27, %v589_v31  ;;  %vm598_vm4 = vweird.f32 %v739_v27 }
 0x302   :  { %740 = vrsqrt.f32 %v590_v29  ;;  %vm599_vm6 = vmor %vm597_vm5, %vm598_vm4  ;;  %vm607_vm8 = vweird.f32 %v590_v29 }
 0x303   :  { %v593_v34 = vmul.f32 %v739_v27, %v592_v33 }
 0x305   :  { %v594_v35 = vmul.f32 0.5, %v593_v34 }
 0x307   :  { %v595_v5 = vsub.f32 1.5, %v594_v35 }
 0x308   :  { %v741_v36 = vpop.eup %740 }
 0x309   :  { %v596_v39 = vmul.f32 %v739_v27, %v595_v5  ;;  %v602_v40 = vmul.f32 %v741_v36, %v590_v29  ;;  %vm608_vm7 = vweird.f32 %v741_v36 }
 0x30a   :  { %vm609_vm9 = vmor %vm607_vm8, %vm608_vm7 }
 0x30b   :  { %v600_v48 = vsel %vm599_vm6, %v739_v27, %v596_v39  ;;  %v603_v61 = vmul.f32 %v741_v36, %v602_v40 }
 0x30c   :  { %v611_v44 = vmul.f32 %v600_v48, %v579_v19 }
 0x30d   :  { %v604_v43 = vmul.f32 0.5, %v603_v61 }
 0x30e   :  { %v617_v15 = vmul.f32 %v736_v41, %v611_v44 }
 0x30f   :  { %v605_v28 = vsub.f32 1.5, %v604_v43 }
 0x310   :  { %v623_v45 = vadd.f32 %v737_v42, %v617_v15 }
 0x311   :  { %v606_v46 = vmul.f32 %v741_v36, %v605_v28 }
 0x312   :  { %625 = vst [vmem:[%s1087_s10] sm:$0xff] %v623_v45 }
 0x313   :  { %v610_v49 = vsel %vm609_vm9, %v741_v36, %v606_v46 }
 0x314   :  { %v612_v50 = vmul.f32 %v610_v49, %v580_v24 }
 0x316   :  { %v618_v51 = vmul.f32 %v736_v41, %v612_v50 }
 0x318   :  { %v624_v37 = vadd.f32 %v737_v42, %v618_v51 }
 0x31a   :  { %626 = vst [vmem:[%s1087_s10 + $0x8] sm:$0xff] %v624_v37 }
 0x31b   :  { %631 = vsyncpa [#allocation3], 1 }
 0x31c   :  { %632 = vsyncpa [#allocation5], 1 }

// kernel: scalar_encoder.1
= control target key start
LH: loop header
LB: loop body
LE: loop exit
PB: predicated region body
PF: predicated region fallthrough
CT: control target
= control target key end

     0   :  { %15 = vsyncpa [#allocation3], 0  ;;  %s1077_s0 = inlined_call_operand.vmem [shape: f32[16,1], index: 0, kind: input, shape index: {}]   ;;  %s1078_s1 = inlined_call_operand.vmem [shape: f32[1,128], index: 1, kind: input, shape index: {}]   ;;  %s1079_s2 = inlined_call_operand.vmem [shape: f32[1,128], index: 2, kind: input, shape index: {}]   ;;  %s1080_s3 = inlined_call_operand.hbm [shape: bf16[128,128], index: 3, kind: input, shape index: {}]   ;;  %s1081_s4 = inlined_call_operand.vmem [shape: f32[1,128], index: 4, kind: input, shape index: {}]   ;;  %s1082_s5 = inlined_call_operand.hbm [shape: bf16[128,128], index: 5, kind: input, shape index: {}]   ;;  %s1083_s6 = inlined_call_operand.vmem [shape: f32[1,128], index: 6, kind: input, shape index: {}]   ;;  %s1084_s7 = inlined_call_operand.vmem [shape: f32[1,128], index: 7, kind: input, shape index: {}]   ;;  %s1085_s8 = inlined_call_operand.vmem [shape: f32[1,128], index: 8, kind: input, shape index: {}]   ;;  %s1086_s9 = inlined_call_operand.vmem [shape: f32[1,128], index: 9, kind: input, shape index: {}]   ;;  %s1087_s10 = inlined_call_operand.vmem [shape: f32[16,128], index: 10, kind: output, shape index: {}]  }
   0x1   :  { %s27_s15 = sshll.u32 %s1080_s3, 4  ;;  %s28_s15 = int_to_ptr.hbm [resolvable:$true] %s27_s15 }
   0x2   :  { %16 = vsyncpa [#allocation5], 0  ;;  %s794_s16 = smov [#allocation2]   ;;  %s42_s20 = sshll.u32 %s1082_s5, 4  ;;  %s43_s20 = int_to_ptr.hbm [resolvable:$true] %s42_s20 }
   0x3   :  { %s29_s17 = sshll.u32 %s794_s16, 4  ;;  %s795_s21 = smov 64   ;;  %s30_s17 = int_to_ptr.vmem [resolvable:$true] %s29_s17 }
   0x4   :  { %s796_s22 = smov 4   ;;  %s797_s23 = smov [#allocation4]  }
   0x5   :  { %35 = dma.hbm_to_vmem [thread:$0]  %s28_s15, 1024, %s30_s17, [#allocation3], %s795_s21, %s795_s21, %s796_s22  }
   0x6   :  { %s44_s24 = sshll.u32 %s797_s23, 4  ;;  %s45_s24 = int_to_ptr.vmem [resolvable:$true] %s44_s24 }
   0x7   :  { %50 = dma.hbm_to_vmem [thread:$0]  %s43_s20, 1024, %s45_s24, [#allocation5], %s795_s21, %s795_s21, %s796_s22  }
   0x8   :  { %790 = dma.done.wait [#allocation3], 1024  }
   0x9   :  { %791 = vsyncadd [#allocation3], 4294966272 }
   0xa   :  { %792 = dma.done.wait [#allocation5], 1024  }
   0xb   :  { %793 = vsyncadd [#allocation5], 4294966272  ;;  %v798_v0 = vmov 0   ;;  %v67_v1 = vld [vmem:[%s1077_s0] sm:$0xff]  ;;  %v68_v2 = vld [vmem:[%s1077_s0 + $0x8] sm:$0xff] }
   0xc   :  { %730 = vset.pattern.permute.xlu0 %v798_v0  ;;  %v731_v3 = vld [vmem:[%s1078_s1] ss:$0 sm:$0xff]  ;;  %v710_v6 = vld [vmem:[#allocation2 + $0x38] sm:$0xff]  ;;  %v709_v8 = vld [vmem:[#allocation2 + $0x30] sm:$0xff]  ;;  %v799_v32 = vmov 2102212464  }
   0xd   :  { %75 = vperm.xlu0 %730, %v67_v1   ;;  %v732_v4 = vld [vmem:[%s1079_s2] ss:$0 sm:$0xff]  ;;  %468 = vmatpush.bf16.msra.mxu0 %v710_v6  ;;  %v708_v12 = vld [vmem:[#allocation2 + $0x28] sm:$0xff]  ;;  %v706_v25 = vld [vmem:[#allocation2 + $0x18] sm:$0xff]  ;;  %v800_v34 = vmov 920167782  }
   0xe   :  { %v707_v19 = vld [vmem:[#allocation2 + $0x20] sm:$0xff]  ;;  %v705_v37 = vld [vmem:[#allocation2 + $0x10] sm:$0xff]  ;;  %v801_v38 = vmov 683565275   ;;  %v802_v41 = vmov 1326507024  }
   0xf   :  { %v803_v43 = vmov 2475754826   ;;  %v804_v47 = vmov 2131351028   ;;  %v704_v54 = vld [vmem:[#allocation2 + $0x8] sm:$0xff] }
  0x11   :  { %469 = vmatpush.bf16.msra.mxu0 %v709_v8 }
  0x15   :  { %80 = vperm.xlu0 %730, %v68_v2   ;;  %470 = vmatpush.bf16.msra.mxu0 %v708_v12 }
  0x19   :  { %471 = vmatpush.bf16.msra.mxu0 %v707_v19 }
  0x1d   :  { %472 = vmatpush.bf16.msra.mxu0 %v706_v25 }
  0x21   :  { %473 = vmatpush.bf16.msra.mxu0 %v705_v37 }
  0x25   :  { %474 = vmatpush.bf16.msra.mxu0 %v704_v54 }
  0x7f   :  { %v76_v5 = vpop.permute.xlu0 %75 }
  0x80   :  { %v83_v7 = vmul.f32 %v731_v3, %v76_v5 }
  0x82   :  { %v879_v9 = vadd.f32 %v732_v4, %v83_v7  ;;  %v703_v7 = vld [vmem:[#allocation2] sm:$0xff] }
  0x83   :  { %475 = vmatpush.bf16.msra.mxu0 %v703_v7 }
  0x84   :  { %v94_v10 = vand.u32 2139095040, %v879_v9  ;;  %v91_v11 = vand.u32 2147483647, %v879_v9 }
  0x86   :  { %v95_v13 = vshrl.u32 %v94_v10, 23  ;;  %v98_v14 = vand.u32 8388607, %v91_v11 }
  0x87   :  { %v81_v15 = vpop.permute.xlu0 %80 }
  0x88   :  { %v633_v16 = vadd.s32 4294967169, %v95_v13  ;;  %v84_v17 = vmul.f32 %v731_v3, %v81_v15  ;;  %v99_v18 = vor.u32 8388608, %v98_v14 }
  0x8a   :  { %v101_v20 = vadd.s32 1, %v633_v16  ;;  %v885_v21 = vadd.f32 %v732_v4, %v84_v17  ;;  %v888_v23 = vshll.u32 %v99_v18, 8 }
  0x8c   :  { %vm102_vm0 = vcmp.gt.s32.totalorder %v101_v20, 0  ;;  %v248_v22 = vand.u32 2139095040, %v885_v21  ;;  %v893_v30 = vand.u32 65535, %v888_v23  ;;  %v245_v31 = vand.u32 2147483647, %v885_v21 }
  0x8d   :  { %v103_v24 = vsel %vm102_vm0, %v101_v20, 0  ;;  %v141_v19 = vshrl.u32 %v888_v23, 16 }
  0x8e   :  { %v105_v26 = vand.u32 31, %v103_v24  ;;  %v249_v27 = vshrl.u32 %v248_v22, 23  ;;  %v890_v28 = vshrl.u32 %v103_v24, 5  ;;  %v911_v4 = vand.u32 8388607, %v245_v31 }
  0x90   :  { %v106_v29 = vsub.s32 32, %v105_v26  ;;  %v117_v33 = vshll.u32 %v799_v32, %v105_v26  ;;  %v120_v35 = vshll.u32 %v800_v34, %v105_v26  ;;  %v636_v36 = vadd.s32 4294967169, %v249_v27 }
  0x91   :  { %v108_v39 = vshll.u32 %v801_v38, %v105_v26  ;;  %v111_v45 = vshll.u32 %v803_v43, %v105_v26  ;;  %v114_v49 = vshll.u32 %v804_v47, %v105_v26  ;;  %vm126_vm1 = vcmp.lt.s32.totalorder %v890_v28, 4 }
  0x92   :  { %v118_v40 = vshrl.u32 %v800_v34, %v106_v29  ;;  %v121_v42 = vshrl.u32 %v802_v41, %v106_v29  ;;  %v109_v44 = vshrl.u32 %v803_v43, %v106_v29  ;;  %v255_v46 = vadd.s32 1, %v636_v36 }
  0x93   :  { %v112_v48 = vshrl.u32 %v804_v47, %v106_v29  ;;  %v115_v50 = vshrl.u32 %v799_v32, %v106_v29  ;;  %v107_v55 = vshrl.u32 %v801_v38, %v106_v29  ;;  %vm123_vm3 = vcmp.lt.s32.totalorder %v890_v28, 1 }
  0x94   :  { %v119_v51 = vor.u32 %v118_v40, %v117_v33  ;;  %v122_v52 = vor.u32 %v121_v42, %v120_v35  ;;  %v110_v53 = vor.u32 %v109_v44, %v108_v39  ;;  %vm256_vm2 = vcmp.gt.s32.totalorder %v255_v46, 0 }
  0x95   :  { %v113_v56 = vor.u32 %v112_v48, %v111_v45  ;;  %v116_v57 = vor.u32 %v115_v50, %v114_v49  ;;  %v257_v60 = vsel %vm256_vm2, %v255_v46, 0  ;;  %vm125_vm4 = vcmp.lt.s32.totalorder %v890_v28, 3 }
  0x96   :  { %v132_v58 = vsel %vm126_vm1, %v119_v51, 920167782  ;;  %v136_v59 = vsel %vm126_vm1, %v122_v52, 1326507024  ;;  %v906_v61 = vand.u32 31, %v257_v60  ;;  %v913_v5 = vshrl.u32 %v257_v60, 5 }
  0x97   :  { %v128_v62 = vsel %vm126_vm1, %v116_v57, 2102212464  ;;  %v131_v63 = vsel %vm123_vm3, %v110_v53, %v113_v56  ;;  %v133_v1 = vsel %vm125_vm4, %v116_v57, %v132_v58  ;;  %v135_v2 = vsel %vm123_vm3, %v113_v56, %v116_v57 }
  0x98   :  { %v137_v3 = vsel %vm125_vm4, %v119_v51, %v136_v59  ;;  %v916_v6 = vsub.s32 32, %v906_v61  ;;  %vm124_vm5 = vcmp.lt.s32.totalorder %v890_v28, 2  ;;  %v127_v8 = vsel %vm123_vm3, %v107_v55, %v110_v53 }
  0x99   :  { %v274_v10 = vshll.u32 %v800_v34, %v906_v61  ;;  %v129_v12 = vsel %vm125_vm4, %v113_v56, %v128_v62  ;;  %v134_v13 = vsel %vm124_vm5, %v131_v63, %v133_v1  ;;  %v138_v14 = vsel %vm124_vm5, %v135_v2, %v137_v3 }
  0x9a   :  { %v272_v15 = vshrl.u32 %v800_v34, %v916_v6  ;;  %v275_v16 = vshrl.u32 %v802_v41, %v916_v6  ;;  %v142_v17 = vand.u32 65535, %v138_v14  ;;  %v143_v18 = vshrl.u32 %v138_v14, 16 }
  0x9b   :  { %v164_v20 = vand.u32 65535, %v134_v13  ;;  %v165_v22 = vshrl.u32 %v134_v13, 16  ;;  %v271_v24 = vshll.u32 %v799_v32, %v906_v61  ;;  %vm280_vm6 = vcmp.lt.s32.totalorder %v913_v5, 4 }
  0x9c   :  { %v276_v25 = vor.u32 %v275_v16, %v274_v10  ;;  %v145_v26 = vmul.u32 %v143_v18, %v893_v30  ;;  %v933_v27 = vsel %vm124_vm5, %v127_v8, %v129_v12  ;;  %v146_v29 = vmul.u32 %v142_v17, %v141_v19 }
  0x9d   :  { %v167_v33 = vmul.u32 %v165_v22, %v893_v30  ;;  %v253_v34 = vor.u32 8388608, %v911_v4  ;;  %v273_v35 = vor.u32 %v272_v15, %v271_v24  ;;  %v144_v36 = vmul.u32 %v142_v17, %v893_v30 }
  0x9e   :  { %v147_v37 = vmul.u32 %v143_v18, %v141_v19  ;;  %v148_v39 = vshll.u32 %v145_v26, 16  ;;  %v290_v40 = vsel %vm280_vm6, %v276_v25, 1326507024  ;;  %v149_v41 = vshrl.u32 %v145_v26, 16 }
  0x9f   :  { %v166_v42 = vmul.u32 %v164_v20, %v893_v30  ;;  %v168_v44 = vmul.u32 %v164_v20, %v141_v19  ;;  %v150_v28 = vshll.u32 %v146_v29, 16  ;;  %v170_v46 = vshll.u32 %v167_v33, 16 }
  0xa0   :  { %vm152_vm7 = vc.u32 %v144_v36, %v148_v39  ;;  %v154_v45 = vadd.s32 %v148_v39, %v144_v36  ;;  %v151_v48 = vshrl.u32 %v146_v29, 16  ;;  %v169_v50 = vmul.u32 %v165_v22, %v141_v19 }
  0xa1   :  { %v153_v49 = vsel %vm152_vm7, 1, %v798_v0  ;;  %v172_v51 = vshll.u32 %v168_v44, 16  ;;  %vm174_vm9 = vc.u32 %v166_v42, %v170_v46  ;;  %v176_v53 = vadd.s32 %v170_v46, %v166_v42 }
  0xa2   :  { %v155_v52 = vadd.s32 %v153_v49, %v147_v37  ;;  %vm156_vm8 = vc.u32 %v154_v45, %v150_v28  ;;  %v175_v55 = vsel %vm174_vm9, 1, %v798_v0  ;;  %v262_v30 = vshll.u32 %v801_v38, %v906_v61 }
  0xa3   :  { %v157_v54 = vsel %vm156_vm8, 1, %v798_v0  ;;  %v263_v56 = vshrl.u32 %v803_v43, %v916_v6  ;;  %v171_v58 = vshrl.u32 %v167_v33, 16  ;;  %v177_v59 = vadd.s32 %v175_v55, %v169_v50 }
  0xa4   :  { %v159_v57 = vadd.s32 %v157_v54, %v155_v52  ;;  %vm178_vm10 = vc.u32 %v176_v53, %v172_v51  ;;  %v265_v63 = vshll.u32 %v803_v43, %v906_v61  ;;  %v266_v1 = vshrl.u32 %v804_v47, %v916_v6 }
  0xa5   :  { %v179_v60 = vsel %vm178_vm10, 1, %v798_v0  ;;  %v949_v62 = vor.u32 %v263_v56, %v262_v30  ;;  %v268_v4 = vshll.u32 %v804_v47, %v906_v61  ;;  %v269_v7 = vshrl.u32 %v799_v32, %v916_v6 }
  0xa6   :  { %v160_v2 = vadd.s32 %v159_v57, %v149_v41  ;;  %v181_v3 = vadd.s32 %v179_v60, %v177_v59  ;;  %v286_v8 = vsel %vm280_vm6, %v273_v35, 920167782  ;;  %v173_v10 = vshrl.u32 %v168_v44, 16 }
  0xa7   :  { %v961_v12 = vor.u32 %v266_v1, %v265_v63  ;;  %vm277_vm11 = vcmp.lt.s32.totalorder %v913_v5, 1  ;;  %v270_v14 = vor.u32 %v269_v7, %v268_v4  ;;  %vm279_vm12 = vcmp.lt.s32.totalorder %v913_v5, 3 }
  0xa8   :  { %v964_v43 = vadd.s32 %v160_v2, %v151_v48  ;;  %v182_v13 = vadd.s32 %v181_v3, %v171_v58  ;;  %v967_v15 = vadd.s32 %v176_v53, %v172_v51  ;;  %v291_v47 = vsel %vm279_vm12, %v273_v35, %v290_v40 }
  0xa9   :  { %v285_v32 = vsel %vm277_vm11, %v949_v62, %v961_v12  ;;  %v975_v61 = vshll.u32 %v253_v34, 8  ;;  %v184_v17 = vmul.u32 %v888_v23, %v933_v27  ;;  %vm278_vm14 = vcmp.lt.s32.totalorder %v913_v5, 2 }
  0xaa   :  { %v183_v16 = vadd.s32 %v182_v13, %v173_v10  ;;  %vm186_vm13 = vc.u32 %v964_v43, %v967_v15  ;;  %v287_v18 = vsel %vm279_vm12, %v270_v14, %v286_v8  ;;  %v289_v19 = vsel %vm277_vm11, %v961_v12, %v270_v14 }
  0xab   :  { %v288_v22 = vsel %vm278_vm14, %v285_v32, %v287_v18  ;;  %v292_v24 = vsel %vm278_vm14, %v289_v19, %v291_v47  ;;  %v294_v23 = vand.u32 65535, %v975_v61  ;;  %v295_v25 = vshrl.u32 %v975_v61, 16 }
  0xac   :  { %v187_v20 = vadd.s32 1, %v183_v16  ;;  %v296_v26 = vand.u32 65535, %v292_v24  ;;  %v297_v27 = vshrl.u32 %v292_v24, 16  ;;  %v318_v29 = vand.u32 65535, %v288_v22 }
  0xad   :  { %v319_v34 = vshrl.u32 %v288_v22, 16  ;;  %v282_v1 = vsel %vm280_vm6, %v270_v14, 2102212464  ;;  %v261_v4 = vshrl.u32 %v801_v38, %v916_v6  ;;  %vm93_vm7 = vcmp.lt.s32.totalorder %v879_v9, 0 }
  0xae   :  { %v188_v33 = vsel %vm186_vm13, %v187_v20, %v183_v16  ;;  %v299_v36 = vmul.u32 %v297_v27, %v294_v23  ;;  %v300_v37 = vmul.u32 %v296_v26, %v295_v25  ;;  %v322_v40 = vmul.u32 %v318_v29, %v295_v25 }
  0xaf   :  { %v189_v35 = vadd.s32 %v188_v33, %v184_v17  ;;  %v321_v39 = vmul.u32 %v319_v34, %v294_v23  ;;  %v298_v42 = vmul.u32 %v296_v26, %v294_v23  ;;  %v301_v28 = vmul.u32 %v297_v27, %v295_v25 }
  0xb0   :  { %v302_v44 = vshll.u32 %v299_v36, 16  ;;  %v320_v45 = vmul.u32 %v318_v29, %v294_v23  ;;  %v304_v49 = vshll.u32 %v300_v37, 16  ;;  %v326_v52 = vshll.u32 %v322_v40, 16 }
  0xb1   :  { %v190_v41 = vadd.s32 536870912, %v189_v35  ;;  %v324_v46 = vshll.u32 %v321_v39, 16  ;;  %v323_v30 = vmul.u32 %v319_v34, %v295_v25  ;;  %v303_v59 = vshrl.u32 %v299_v36, 16 }
  0xb2   :  { %vm306_vm15 = vc.u32 %v298_v42, %v302_v44  ;;  %v308_v50 = vadd.s32 %v302_v44, %v298_v42  ;;  %v305_v8 = vshrl.u32 %v300_v37, 16  ;;  %v325_v10 = vshrl.u32 %v321_v39, 16 }
  0xb3   :  { %v993_v48 = vshrl.u32 %v190_v41, 30  ;;  %v307_v51 = vsel %vm306_vm15, 1, %v798_v0  ;;  %vm328_vm0 = vc.u32 %v320_v45, %v324_v46  ;;  %v330_v53 = vadd.s32 %v324_v46, %v320_v45 }
  0xb4   :  { %v309_v55 = vadd.s32 %v307_v51, %v301_v28  ;;  %vm310_vm1 = vc.u32 %v308_v50, %v304_v49  ;;  %v329_v57 = vsel %vm328_vm0, 1, %v798_v0  ;;  %v281_v47 = vsel %vm277_vm11, %v261_v4, %v949_v62  ;;  %v718_v4 = vld [vmem:[#allocation4 + $0x38] sm:$0xff] }
  0xb5   :  { %v192_v54 = vshll.u32 %v993_v48, 30  ;;  %v311_v56 = vsel %vm310_vm1, 1, %v798_v0  ;;  %vm332_vm2 = vc.u32 %v330_v53, %v326_v52  ;;  %v331_v63 = vadd.s32 %v329_v57, %v323_v30  ;;  %553 = vmatpush.bf16.msra.mxu1 %v718_v4 }
  0xb6   :  { %v313_v60 = vadd.s32 %v311_v56, %v309_v55  ;;  %v333_v2 = vsel %vm332_vm2, 1, %v798_v0  ;;  %v283_v14 = vsel %vm279_vm12, %v961_v12, %v282_v1  ;;  %v327_v17 = vshrl.u32 %v322_v40, 16 }
  0xb7   :  { %v193_v58 = vsub.s32 %v189_v35, %v192_v54  ;;  %v335_v13 = vadd.s32 %v333_v2, %v331_v63  ;;  %v334_v19 = vadd.s32 %v330_v53, %v326_v52  ;;  %v284_v38 = vsel %vm278_vm14, %v281_v47, %v283_v14 }
  0xb8   :  { %v314_v7 = vadd.s32 %v313_v60, %v303_v59  ;;  %v338_v62 = vmul.u32 %v975_v61, %v284_v38  ;;  %v185_v23 = vadd.s32 %v967_v15, %v964_v43  ;;  %vm1021_vm8 = vcmp.le.f32.partialorder %v91_v11, 0.7853982 }
  0xb9   :  { %vm194_vm3 = vcmp.lt.s32.totalorder %v193_v58, 0  ;;  %v195_v3 = vsub.s32 0, %v193_v58  ;;  %v336_v18 = vadd.s32 %v335_v13, %v325_v10  ;;  %v717_v13 = vld [vmem:[#allocation4 + $0x30] sm:$0xff]  ;;  %vm247_vm10 = vcmp.lt.s32.totalorder %v885_v21, 0 }
  0xba   :  { %v315_v0 = vadd.s32 %v314_v7, %v305_v8  ;;  %554 = vmatpush.bf16.msra.mxu1 %v717_v13  ;;  %vm1033_vm11 = vcmp.le.f32.partialorder %v245_v31, 0.7853982  ;;  %vm234_vm2 = vweird.f32 %v879_v9 }
  0xbb   :  { %v196_v32 = vsel %vm194_vm3, %v195_v3, %v193_v58  ;;  %v337_v6 = vadd.s32 %v336_v18, %v327_v17  ;;  %vm388_vm3 = vweird.f32 %v885_v21 }
  0xbc   :  { %v197_v16 = vclz %v196_v32  ;;  %vm340_vm4 = vc.u32 %v315_v0, %v334_v19  ;;  %v339_v55 = vadd.s32 %v334_v19, %v315_v0  ;;  %v716_v0 = vld [vmem:[#allocation4 + $0x28] sm:$0xff] }
  0xbd   :  { %v341_v22 = vadd.s32 1, %v337_v6 }
  0xbe   :  { %v634_v20 = vadd.s32 4294967294, %v197_v16  ;;  %555 = vmatpush.bf16.msra.mxu1 %v716_v0 }
  0xbf   :  { %v342_v26 = vsel %vm340_vm4, %v341_v22, %v337_v6 }
  0xc0   :  { %vm635_vm5 = vcmp.lt.s32.totalorder %v634_v20, 0  ;;  %v343_v27 = vadd.s32 %v342_v26, %v338_v62 }
  0xc1   :  { %v200_v24 = vsel %vm635_vm5, 0, %v634_v20  ;;  %v215_v20 = vsub.s32 4, %v993_v48 }
  0xc2   :  { %v201_v12 = vsub.s32 32, %v200_v24  ;;  %v205_v25 = vsub.s32 4294967266, %v200_v24  ;;  %v202_v29 = vshll.u32 %v193_v58, %v200_v24  ;;  %v344_v35 = vadd.s32 536870912, %v343_v27  ;;  %v715_v24 = vld [vmem:[#allocation4 + $0x20] sm:$0xff] }
  0xc3   :  { %v216_v31 = vsel %vm93_vm7, %v215_v20, %v993_v48  ;;  %556 = vmatpush.bf16.msra.mxu1 %v715_v24 }
  0xc4   :  { %v203_v33 = vshrl.u32 %v185_v23, %v201_v12  ;;  %v206_v34 = vadd.s32 127, %v205_v25  ;;  %v1015_v37 = vshrl.u32 %v344_v35, 30 }
  0xc6   :  { %v204_v5 = vor.u32 %v203_v33, %v202_v29  ;;  %v207_v36 = vshll.u32 %v206_v34, 23  ;;  %v346_v40 = vshll.u32 %v1015_v37, 30  ;;  %v369_v25 = vsub.s32 4, %v1015_v37 }
  0xc7   :  { %v218_v33 = vsel %vm1021_vm8, 0, %v216_v31 }
  0xc8   :  { %v208_v39 = vor.u32 4788187, %v207_v36  ;;  %v211_v61 = vcvt.s32.f32 %v204_v5  ;;  %v347_v42 = vsub.s32 %v343_v27, %v346_v40  ;;  %v370_v36 = vsel %vm247_vm10, %v369_v25, %v1015_v37 }
  0xc9   :  { %v235_v48 = vand.u32 3, %v218_v33 }
  0xca   :  { %v209_v41 = vand.u32 2147483647, %v208_v39  ;;  %vm348_vm6 = vcmp.lt.s32.totalorder %v347_v42, 0  ;;  %v349_v43 = vsub.s32 0, %v347_v42 }
  0xcb   :  { %vm237_vm12 = vcmp.eq.s32.totalorder %v235_v48, 0  ;;  %vm240_vm13 = vcmp.eq.s32.totalorder %v235_v48, 2  ;;  %vm236_vm14 = vcmp.lt.s32.totalorder %v235_v48, 2 }
  0xcc   :  { %v212_v44 = vmul.f32 %v211_v61, %v209_v41  ;;  %v350_v28 = vsel %vm348_vm6, %v349_v43, %v347_v42 }
  0xcd   :  { %v351_v49 = vclz %v350_v28 }
  0xce   :  { %v213_v15 = vxor.u32 2147483648, %v212_v44 }
  0xcf   :  { %v637_v52 = vadd.s32 4294967294, %v351_v49 }
  0xd0   :  { %v214_v46 = vsel %vm93_vm7, %v213_v15, %v212_v44 }
  0xd1   :  { %v217_v50 = vsel %vm1021_vm8, %v879_v9, %v214_v46  ;;  %vm638_vm9 = vcmp.lt.s32.totalorder %v637_v52, 0  ;;  %v733_v9 = vld [vmem:[%s1081_s4] ss:$0 sm:$0xff] }
  0xd2   :  { %v219_v51 = vmul.f32 %v217_v50, %v217_v50  ;;  %v354_v54 = vsel %vm638_vm9, 0, %v637_v52 }
  0xd3   :  { %v355_v30 = vsub.s32 32, %v354_v54  ;;  %v359_v56 = vsub.s32 4294967266, %v354_v54  ;;  %v356_v58 = vshll.u32 %v347_v42, %v354_v54  ;;  %v372_v42 = vsel %vm1033_vm11, 0, %v370_v36 }
  0xd4   :  { %v227_v53 = vmul.f32 -0.00019511016, %v219_v51  ;;  %v220_v60 = vmul.f32 -0.001358992, %v219_v51  ;;  %v389_v46 = vand.u32 3, %v372_v42 }
  0xd5   :  { %v357_v11 = vshrl.u32 %v339_v55, %v355_v30  ;;  %v360_v59 = vadd.s32 127, %v359_v56  ;;  %v737_v42 = vld [vmem:[%s1085_s8] ss:$0 sm:$0xff] }
  0xd6   :  { %v228_v57 = vadd.f32 0.008332121, %v227_v53  ;;  %v221_v7 = vadd.f32 0.041655596, %v220_v60  ;;  %vm391_vm15 = vcmp.eq.s32.totalorder %v389_v46, 0  ;;  %vm394_vm0 = vcmp.eq.s32.totalorder %v389_v46, 2 }
  0xd7   :  { %v358_v63 = vor.u32 %v357_v11, %v356_v58  ;;  %v361_v1 = vshll.u32 %v360_v59, 23  ;;  %vm390_vm1 = vcmp.lt.s32.totalorder %v389_v46, 2  ;;  %v714_v58 = vld [vmem:[#allocation4 + $0x18] sm:$0xff]  ;;  %v713_v59 = vld [vmem:[#allocation4 + $0x10] sm:$0xff]  ;;  %v712_v60 = vld [vmem:[#allocation4 + $0x8] sm:$0xff] }
  0xd8   :  { %v229_v2 = vmul.f32 %v228_v57, %v219_v51  ;;  %v222_v14 = vmul.f32 %v221_v7, %v219_v51  ;;  %557 = vmatpush.bf16.msra.mxu1 %v714_v58 }
  0xd9   :  { %v362_v3 = vor.u32 4788187, %v361_v1  ;;  %v365_v10 = vcvt.s32.f32 %v358_v63  ;;  %v711_v63 = vld [vmem:[#allocation4] sm:$0xff] }
  0xda   :  { %v230_v32 = vadd.f32 -0.16666654, %v229_v2  ;;  %v223_v6 = vadd.f32 -0.4999988, %v222_v14 }
  0xdb   :  { %v363_v8 = vand.u32 2147483647, %v362_v3 }
  0xdc   :  { %v231_v17 = vmul.f32 %v230_v32, %v219_v51  ;;  %v224_v26 = vmul.f32 %v223_v6, %v219_v51  ;;  %558 = vmatpush.bf16.msra.mxu1 %v713_v59 }
  0xdd   :  { %v366_v47 = vmul.f32 %v365_v10, %v363_v8  ;;  %v734_v10 = vld [vmem:[%s1083_s6] ss:$0 sm:$0xff] }
  0xde   :  { %v232_v62 = vadd.f32 1.0, %v231_v17  ;;  %v225_v39 = vadd.f32 1.0, %v224_v26  ;;  %v735_v17 = vld [vmem:[%s1086_s9] ss:$0 sm:$0xff] }
  0xdf   :  { %v367_v16 = vxor.u32 2147483648, %v366_v47 }
  0xe0   :  { %v233_v34 = vmul.f32 %v232_v62, %v217_v50  ;;  %v241_v15 = vxor.u32 2147483648, %v225_v39  ;;  %559 = vmatpush.bf16.msra.mxu1 %v712_v60 }
  0xe1   :  { %v368_v19 = vsel %vm247_vm10, %v367_v16, %v366_v47 }
  0xe2   :  { %v371_v38 = vsel %vm1033_vm11, %v885_v21, %v368_v19  ;;  %v238_v61 = vxor.u32 2147483648, %v233_v34  ;;  %v242_v37 = vsel %vm240_vm13, %v241_v15, %v233_v34 }
  0xe3   :  { %v373_v22 = vmul.f32 %v371_v38, %v371_v38 }
  0xe4   :  { %v239_v49 = vsel %vm237_vm12, %v225_v39, %v238_v61  ;;  %560 = vmatpush.bf16.msra.mxu1 %v711_v63 }
  0xe5   :  { %v374_v23 = vmul.f32 -0.001358992, %v373_v22  ;;  %v381_v12 = vmul.f32 -0.00019511016, %v373_v22  ;;  %v243_v53 = vsel %vm236_vm14, %v239_v49, %v242_v37 }
  0xe6   :  { %v244_v56 = vsel %vm234_vm2, nan, %v243_v53 }
  0xe7   :  { %v375_v27 = vadd.f32 0.041655596, %v374_v23  ;;  %v382_v29 = vadd.f32 0.008332121, %v381_v12 }
  0xe9   :  { %v376_v35 = vmul.f32 %v375_v27, %v373_v22  ;;  %v383_v5 = vmul.f32 %v382_v29, %v373_v22 }
  0xeb   :  { %v377_v40 = vadd.f32 -0.4999988, %v376_v35  ;;  %v384_v41 = vadd.f32 -0.16666654, %v383_v5 }
  0xed   :  { %v378_v44 = vmul.f32 %v377_v40, %v373_v22  ;;  %v385_v43 = vmul.f32 %v384_v41, %v373_v22  ;;  %v736_v41 = vld [vmem:[%s1084_s7] ss:$0 sm:$0xff] }
  0xef   :  { %v379_v28 = vadd.f32 1.0, %v378_v44  ;;  %v386_v45 = vadd.f32 1.0, %v385_v43 }
  0xf1   :  { %v387_v50 = vmul.f32 %v386_v45, %v371_v38  ;;  %v395_v51 = vxor.u32 2147483648, %v379_v28 }
  0xf3   :  { %v392_v52 = vxor.u32 2147483648, %v387_v50  ;;  %v396_v55 = vsel %vm394_vm0, %v395_v51, %v387_v50 }
  0xf5   :  { %v393_v54 = vsel %vm391_vm15, %v379_v28, %v392_v52 }
  0xf6   :  { %v397_v30 = vsel %vm390_vm1, %v393_v54, %v396_v55 }
  0xf7   :  { %v398_v11 = vsel %vm388_vm3, nan, %v397_v30 }
  0xf8   :  { %v399_v57 = vpack.c.bf16 %v398_v11, %v244_v56 }
  0xfa   :  { %476 = vmatmul.bf16.vlgmr.msra.gmra.mxu0 %v399_v57 }
 0x177   :  { %v477_v1 = vpop.f32.mrf.mxu0 }
 0x178   :  { %v478_v2 = vadd.f32 %v733_v9, %v477_v1 }
 0x17a   :  { %v482_v4 = vmax.f32 %v478_v2, 0.0 }
 0x17f   :  { %v479_v21 = vpop.f32.mrf.mxu0 }
 0x180   :  { %v480_v3 = vadd.f32 %v733_v9, %v479_v21 }
 0x182   :  { %v483_v7 = vmax.f32 %v480_v3, 0.0 }
 0x184   :  { %v484_v8 = vpack.c.bf16 %v483_v7, %v482_v4 }
 0x186   :  { %561 = vmatmul.bf16.vlgmr.msra.gmra.mxu1 %v484_v8 }
 0x203   :  { %v562_v13 = vpop.f32.mrf.mxu1 }
 0x204   :  { %v563_v32 = vadd.f32 %v734_v10, %v562_v13 }
 0x206   :  { %567 = vadd.xlane.f32.xlu1 %v563_v32 }
 0x20b   :  { %v564_v47 = vpop.f32.mrf.mxu1 }
 0x20c   :  { %v565_v14 = vadd.f32 %v734_v10, %v564_v47 }
 0x20e   :  { %569 = vadd.xlane.f32.xlu1 %v565_v14 }
 0x279   :  { %v568_v16 = vpop.xlane.xlu1 %567 }
 0x27a   :  { %v571_v0 = vmul.f32 0.03125, %v568_v16 }
 0x27c   :  { %v573_v18 = vsub.f32 %v563_v32, %v571_v0 }
 0x27e   :  { %v579_v19 = vmul.f32 %v735_v17, %v573_v18 }
 0x280   :  { %v581_v20 = vmul.f32 %v579_v19, %v579_v19 }
 0x281   :  { %v570_v38 = vpop.xlane.xlu1 %569 }
 0x282   :  { %v572_v6 = vmul.f32 0.03125, %v570_v38  ;;  %583 = vadd.xlane.f32.xlu2 %v581_v20 }
 0x284   :  { %v574_v22 = vsub.f32 %v565_v14, %v572_v6 }
 0x286   :  { %v580_v24 = vmul.f32 %v735_v17, %v574_v22 }
 0x288   :  { %v582_v62 = vmul.f32 %v580_v24, %v580_v24 }
 0x28a   :  { %585 = vadd.xlane.f32.xlu2 %v582_v62 }
 0x2f5   :  { %v584_v23 = vpop.xlane.xlu2 %583 }
 0x2f6   :  { %v587_v12 = vmul.f32 0.03125, %v584_v23 }
 0x2f8   :  { %v589_v31 = vadd.f32 1e-05, %v587_v12 }
 0x2fa   :  { %738 = vrsqrt.f32 %v589_v31  ;;  %vm597_vm5 = vweird.f32 %v589_v31 }
 0x2fd   :  { %v586_v25 = vpop.xlane.xlu2 %585 }
 0x2fe   :  { %v588_v26 = vmul.f32 0.03125, %v586_v25 }
 0x300   :  { %v739_v27 = vpop.eup %738  ;;  %v590_v29 = vadd.f32 1e-05, %v588_v26 }
 0x301   :  { %v592_v33 = vmul.f32 %v739_v27, %v589_v31  ;;  %vm598_vm4 = vweird.f32 %v739_v27 }
 0x302   :  { %740 = vrsqrt.f32 %v590_v29  ;;  %vm599_vm6 = vmor %vm597_vm5, %vm598_vm4  ;;  %vm607_vm8 = vweird.f32 %v590_v29 }
 0x303   :  { %v593_v34 = vmul.f32 %v739_v27, %v592_v33 }
 0x305   :  { %v594_v35 = vmul.f32 0.5, %v593_v34 }
 0x307   :  { %v595_v5 = vsub.f32 1.5, %v594_v35 }
 0x308   :  { %v741_v36 = vpop.eup %740 }
 0x309   :  { %v596_v39 = vmul.f32 %v739_v27, %v595_v5  ;;  %v602_v40 = vmul.f32 %v741_v36, %v590_v29  ;;  %vm608_vm7 = vweird.f32 %v741_v36 }
 0x30a   :  { %vm609_vm9 = vmor %vm607_vm8, %vm608_vm7 }
 0x30b   :  { %v600_v48 = vsel %vm599_vm6, %v739_v27, %v596_v39  ;;  %v603_v61 = vmul.f32 %v741_v36, %v602_v40 }
 0x30c   :  { %v611_v44 = vmul.f32 %v600_v48, %v579_v19 }
 0x30d   :  { %v604_v43 = vmul.f32 0.5, %v603_v61 }
 0x30e   :  { %v617_v15 = vmul.f32 %v736_v41, %v611_v44 }
 0x30f   :  { %v605_v28 = vsub.f32 1.5, %v604_v43 }
 0x310   :  { %v623_v45 = vadd.f32 %v737_v42, %v617_v15 }
 0x311   :  { %v606_v46 = vmul.f32 %v741_v36, %v605_v28 }
 0x312   :  { %625 = vst [vmem:[%s1087_s10] sm:$0xff] %v623_v45 }
 0x313   :  { %v610_v49 = vsel %vm609_vm9, %v741_v36, %v606_v46 }
 0x314   :  { %v612_v50 = vmul.f32 %v610_v49, %v580_v24 }
 0x316   :  { %v618_v51 = vmul.f32 %v736_v41, %v612_v50 }
 0x318   :  { %v624_v37 = vadd.f32 %v737_v42, %v618_v51 }
 0x31a   :  { %626 = vst [vmem:[%s1087_s10 + $0x8] sm:$0xff] %v624_v37 }
 0x31b   :  { %631 = vsyncpa [#allocation3], 1 }
 0x31c   :  { %632 = vsyncpa [#allocation5], 1 }

</bundles_post_ra>
